<compile_context>
chip_gen: v5e
topology: v5e:2x2
jax: 0.10.0
libtpu: 0.0.40
codegen_flags: <defaults>
</compile_context>

<pallas_src>
import math
import functools

import jax
import jax.numpy as jnp
from jax.experimental import pallas as pl
from jax.experimental.pallas import tpu as pltpu


# ----------------------------------------------------------------------------
# small helpers
# ----------------------------------------------------------------------------
def _round_up(x, m):
    return ((x + m - 1) // m) * m


def _row_block(n, target=512):
    """Largest divisor of n that is <= target and a multiple of 8 (else n)."""
    if n <= target:
        return n
    for d in range(target, 7, -1):
        if n % d == 0 and d % 8 == 0:
            return d
    return n


def _phase_group(x, K, stride, pad):
    """Prepare input for the phase-decomposed stencil kernels.

    Returns (x_grouped, Hin, Win, Ho, Wo, PL, PR).  For stride>1 the wrapper
    folds the stride*stride spatial phases into the channel (lane) dim so the
    kernel only ever needs unit-stride static slices:
      x_grouped[n, i, j, (p*stride+q)*C + c] = x[n, stride*i+p, stride*j+q, c]
    """
    N, H, W, C = x.shape
    Ho = (H + 2 * pad - K) // stride + 1
    Wo = (W + 2 * pad - K) // stride + 1
    offs = [(d - pad) // stride for d in range(K)]
    PL, PR = -min(offs), max(offs)
    if stride == 1:
        return x, H, W, Ho, Wo, PL, PR
    Hq, Wq = _round_up(H, stride), _round_up(W, stride)
    if (Hq, Wq) != (H, W):
        x = jnp.pad(x, ((0, 0), (0, Hq - H), (0, Wq - W), (0, 0)))
    Hin, Win = Hq // stride, Wq // stride
    x = x.reshape(N, Hin, stride, Win, stride, C)
    x = jnp.transpose(x, (0, 1, 3, 2, 4, 5)).reshape(N, Hin, Win,
                                                     stride * stride * C)
    return x, Hin, Win, Ho, Wo, PL, PR


# ----------------------------------------------------------------------------
# Kernel 1: tiled matmul + folded BN (+ReLU)   (shortcut 1x1 conv, fc1, fc2)
# ----------------------------------------------------------------------------
def _matmul_bn_act_kernel(x_ref, w_ref, s_ref, b_ref, o_ref, *, relu):
    y = jnp.dot(x_ref[...].astype(jnp.bfloat16), w_ref[...],
                preferred_element_type=jnp.float32)
    y = y * s_ref[...] + b_ref[...]
    if relu:
        y = jnp.maximum(y, 0.0)
    o_ref[...] = y


def matmul_bn_act(x, w, scale, bias, relu, tm=512):
    M, K = x.shape
    N = w.shape[1]
    Np = _round_up(N, 128)                       # lane-dense output stores
    if Np != N:
        w = jnp.pad(w, ((0, 0), (0, Np - N)))
        scale = jnp.pad(scale, (0, Np - N))
        bias = jnp.pad(bias, (0, Np - N))
    TM = min(tm, _round_up(M, 8))
    Mp = _round_up(M, TM)
    if Mp != M:
        x = jnp.pad(x, ((0, Mp - M), (0, 0)))
    out = pl.pallas_call(
        functools.partial(_matmul_bn_act_kernel, relu=relu),
        out_shape=jax.ShapeDtypeStruct((Mp, Np), jnp.float32),
        grid=(Mp // TM,),
        in_specs=[pl.BlockSpec((TM, K), lambda i: (i, 0)),
                  pl.BlockSpec((K, Np), lambda i: (0, 0)),
                  pl.BlockSpec((1, Np), lambda i: (0, 0)),
                  pl.BlockSpec((1, Np), lambda i: (0, 0))],
        out_specs=pl.BlockSpec((TM, Np), lambda i: (i, 0)),
        compiler_params=pltpu.CompilerParams(dimension_semantics=("parallel",)),
    )(x, w.astype(jnp.bfloat16), scale.reshape(1, Np), bias.reshape(1, Np))
    if Mp != M or Np != N:
        out = out[:M, :N]
    return out


def conv1x1_bn_act(x, w, scale, bias, relu):
    N, H, W, Cin = x.shape
    Cout = w.shape[1]
    y = matmul_bn_act(x.reshape(N * H * W, Cin), w, scale, bias, relu)
    return y.reshape(N, H, W, Cout)


# ----------------------------------------------------------------------------
# Kernel 2: fused Ghost module (1x1 conv + BN/act + 3x3 dw + BN/act + concat,
#           with optional fused residual add)
# ----------------------------------------------------------------------------
def _ghost_kernel(x_ref, pw_ref, ps_ref, pb_ref, cw_ref, cs_ref, cb_ref,
                  *rest, relu, has_res):
    if has_res:
        res_ref, o_ref, x1p_ref = rest
    else:
        o_ref, x1p_ref = rest
        res_ref = None
    H, W = x_ref.shape[1], x_ref.shape[2]
    Cin = x_ref.shape[3]
    IC = pw_ref.shape[1]

    # primary 1x1 conv + BN (+ReLU) on the MXU (bf16 inputs, f32 accumulate)
    x2d = x_ref[0].reshape(H * W, Cin).astype(jnp.bfloat16)
    y = jnp.dot(x2d, pw_ref[...], preferred_element_type=jnp.float32)
    y = y * ps_ref[...] + pb_ref[...]
    if relu:
        y = jnp.maximum(y, 0.0)
    x1 = y.reshape(H, W, IC)

    # cheap 3x3 depthwise conv + BN (+ReLU) via zero-padded VMEM scratch
    x1p_ref[...] = jnp.zeros_like(x1p_ref)
    x1p_ref[1:H + 1, 1:W + 1, :] = x1
    acc = jnp.zeros((H, W, IC), jnp.float32)
    for dh in range(3):
        for dw in range(3):
            acc = acc + x1p_ref[dh:dh + H, dw:dw + W, :] * cw_ref[dh, dw, :]
    x2 = acc * cs_ref[...] + cb_ref[...]
    if relu:
        x2 = jnp.maximum(x2, 0.0)

    out = jnp.concatenate([x1, x2], axis=-1)      # concat once, in VMEM
    if has_res:
        out = out + res_ref[0]                    # fused residual add
    o_ref[0] = out


def ghost_module_fwd(p, x, residual=None):
    # TODO(synk): for very large resolutions, tile over H rows with a halo
    # instead of one whole image per grid step (VMEM budget on v7x).
    N, H, W, Cin = x.shape
    IC = p["primary_w"].shape[1]
    oup = p["oup"]
    has_res = residual is not None
    in_specs = [
        pl.BlockSpec((1, H, W, Cin), lambda n: (n, 0, 0, 0)),
        pl.BlockSpec((Cin, IC), lambda n: (0, 0)),
        pl.BlockSpec((1, IC), lambda n: (0, 0)),
        pl.BlockSpec((1, IC), lambda n: (0, 0)),
        pl.BlockSpec((3, 3, IC), lambda n: (0, 0, 0)),
        pl.BlockSpec((1, 1, IC), lambda n: (0, 0, 0)),
        pl.BlockSpec((1, 1, IC), lambda n: (0, 0, 0)),
    ]
    args = [x,
            p["primary_w"].astype(jnp.bfloat16),
            p["primary_scale"].reshape(1, IC),
            p["primary_bias"].reshape(1, IC),
            p["cheap_w"],
            p["cheap_scale"].reshape(1, 1, IC),
            p["cheap_bias"].reshape(1, 1, IC)]
    if has_res:
        in_specs.append(pl.BlockSpec((1, H, W, oup), lambda n: (n, 0, 0, 0)))
        args.append(residual)
    return pl.pallas_call(
        functools.partial(_ghost_kernel, relu=p["relu"], has_res=has_res),
        out_shape=jax.ShapeDtypeStruct((N, H, W, oup), jnp.float32),
        grid=(N,),
        in_specs=in_specs,
        out_specs=pl.BlockSpec((1, H, W, oup), lambda n: (n, 0, 0, 0)),
        scratch_shapes=[pltpu.VMEM((H + 2, W + 2, IC), jnp.float32)],
        compiler_params=pltpu.CompilerParams(dimension_semantics=("parallel",)),
    )(*args)


# ----------------------------------------------------------------------------
# Kernel 3: KxK depthwise conv + BN (+ReLU), direct strided output via
#           phase decomposition (only unit-stride static slices in-kernel)
# ----------------------------------------------------------------------------
def _dw_kernel(x_ref, w_ref, s_ref, b_ref, o_ref, xp_ref, *,
               K, stride, pad, PL, relu):
    Hin, Win = x_ref.shape[1], x_ref.shape[2]
    Ho, Wo, C = o_ref.shape[1], o_ref.shape[2], o_ref.shape[3]
    xp_ref[...] = jnp.zeros_like(xp_ref)
    xp_ref[PL:PL + Hin, PL:PL + Win, :] = x_ref[0]
    acc = jnp.zeros((Ho, Wo, C), jnp.float32)
    for dh in range(K):
        ah, ph = divmod(dh - pad, stride)
        for dw in range(K):
            aw, pw = divmod(dw - pad, stride)
            cg = (ph * stride + pw) * C
            acc = acc + (xp_ref[PL + ah:PL + ah + Ho,
                                PL + aw:PL + aw + Wo, cg:cg + C]
                         * w_ref[dh, dw, :])
    y = acc * s_ref[...] + b_ref[...]
    if relu:
        y = jnp.maximum(y, 0.0)
    o_ref[0] = y


def dwconv_bn_act(x, w, scale, bias, stride, relu):
    N, H, W, C = x.shape
    K = w.shape[0]
    pad = (K - 1) // 2
    xg, Hin, Win, Ho, Wo, PL, PR = _phase_group(x, K, stride, pad)
    SH, SW = PL + Ho + PR, PL + Wo + PR
    assert Hin <= Ho + PR and Win <= Wo + PR
    G = stride * stride
    return pl.pallas_call(
        functools.partial(_dw_kernel, K=K, stride=stride, pad=pad, PL=PL,
                          relu=relu),
        out_shape=jax.ShapeDtypeStruct((N, Ho, Wo, C), jnp.float32),
        grid=(N,),
        in_specs=[pl.BlockSpec((1, Hin, Win, G * C), lambda n: (n, 0, 0, 0)),
                  pl.BlockSpec((K, K, C), lambda n: (0, 0, 0)),
                  pl.BlockSpec((1, 1, C), lambda n: (0, 0, 0)),
                  pl.BlockSpec((1, 1, C), lambda n: (0, 0, 0))],
        out_specs=pl.BlockSpec((1, Ho, Wo, C), lambda n: (n, 0, 0, 0)),
        scratch_shapes=[pltpu.VMEM((SH, SW, G * C), jnp.float32)],
        compiler_params=pltpu.CompilerParams(dimension_semantics=("parallel",)),
    )(xg, w, scale.reshape(1, 1, C), bias.reshape(1, 1, C))


# ----------------------------------------------------------------------------
# Kernel 4: dense KxK conv (stem) with in-kernel im2col from a padded scratch
# ----------------------------------------------------------------------------
def _stem_kernel(x_ref, w_ref, s_ref, b_ref, o_ref, xp_ref, *,
                 K, stride, pad, PL, relu):
    Hin, Win = x_ref.shape[1], x_ref.shape[2]
    Ho, Wo, Cout = o_ref.shape[1], o_ref.shape[2], o_ref.shape[3]
    Cin = w_ref.shape[0] // (K * K)
    xp_ref[...] = jnp.zeros_like(xp_ref)
    xp_ref[PL:PL + Hin, PL:PL + Win, :] = x_ref[0]
    cols = []
    for dh in range(K):
        ah, ph = divmod(dh - pad, stride)
        for dw in range(K):
            aw, pw = divmod(dw - pad, stride)
            cg = (ph * stride + pw) * Cin
            cols.append(xp_ref[PL + ah:PL + ah + Ho,
                               PL + aw:PL + aw + Wo, cg:cg + Cin])
    patches = jnp.concatenate(cols, axis=-1).reshape(Ho * Wo, K * K * Cin)
    y = jnp.dot(patches.astype(jnp.bfloat16), w_ref[...],
                preferred_element_type=jnp.float32)
    y = y * s_ref[...] + b_ref[...]
    if relu:
        y = jnp.maximum(y, 0.0)
    o_ref[0] = y.reshape(Ho, Wo, Cout)


def conv3x3_bn_act(x, w, scale, bias, stride, relu=True):
    N, H, W, Cin = x.shape
    K = w.shape[0]
    Cout = w.shape[-1]
    pad = K // 2
    xg, Hin, Win, Ho, Wo, PL, PR = _phase_group(x, K, stride, pad)
    SH, SW = PL + Ho + PR, PL + Wo + PR
    G = stride * stride
    w2 = w.reshape(K * K * Cin, Cout).astype(jnp.bfloat16)   # (dh, dw, ci) order
    return pl.pallas_call(
        functools.partial(_stem_kernel, K=K, stride=stride, pad=pad, PL=PL,
                          relu=relu),
        out_shape=jax.ShapeDtypeStruct((N, Ho, Wo, Cout), jnp.float32),
        grid=(N,),
        in_specs=[pl.BlockSpec((1, Hin, Win, G * Cin), lambda n: (n, 0, 0, 0)),
                  pl.BlockSpec((K * K * Cin, Cout), lambda n: (0, 0)),
                  pl.BlockSpec((1, Cout), lambda n: (0, 0)),
                  pl.BlockSpec((1, Cout), lambda n: (0, 0))],
        out_specs=pl.BlockSpec((1, Ho, Wo, Cout), lambda n: (n, 0, 0, 0)),
        scratch_shapes=[pltpu.VMEM((SH, SW, G * Cin), jnp.float32)],
        compiler_params=pltpu.CompilerParams(dimension_semantics=("parallel",)),
    )(xg, w2, scale.reshape(1, Cout), bias.reshape(1, Cout))


# ----------------------------------------------------------------------------
# Kernel 5: head 1x1 conv + BN + ReLU fused with global average pooling
#           (accumulator output block revisited across the row-tile axis)
# ----------------------------------------------------------------------------
def _head_pool_kernel(x_ref, w_ref, s_ref, b_ref, o_ref, *, relu, inv_hw):
    m = pl.program_id(1)

    @pl.when(m == 0)
    def _init():
        o_ref[...] = jnp.zeros_like(o_ref)

    y = jnp.dot(x_ref[0].astype(jnp.bfloat16), w_ref[...],
                preferred_element_type=jnp.float32)
    y = y * s_ref[...] + b_ref[...]
    if relu:
        y = jnp.maximum(y, 0.0)
    part = jnp.sum(y, axis=0) * inv_hw
    o_ref[...] = o_ref[...] + part.reshape(1, 1, -1)


def head_conv_pool(x, w, scale, bias, relu=True):
    N, H, W, Cin = x.shape
    HW = H * W
    Cout = w.shape[1]
    Cp = _round_up(Cout, 128)                    # lane-dense head channels
    if Cp != Cout:
        w = jnp.pad(w, ((0, 0), (0, Cp - Cout)))
        scale = jnp.pad(scale, (0, Cp - Cout))
        bias = jnp.pad(bias, (0, Cp - Cout))
    TM = _row_block(HW)
    nM = HW // TM
    out = pl.pallas_call(
        functools.partial(_head_pool_kernel, relu=relu, inv_hw=1.0 / HW),
        out_shape=jax.ShapeDtypeStruct((N, 1, Cp), jnp.float32),
        grid=(N, nM),
        in_specs=[pl.BlockSpec((1, TM, Cin), lambda n, m: (n, m, 0)),
                  pl.BlockSpec((Cin, Cp), lambda n, m: (0, 0)),
                  pl.BlockSpec((1, Cp), lambda n, m: (0, 0)),
                  pl.BlockSpec((1, Cp), lambda n, m: (0, 0))],
        out_specs=pl.BlockSpec((1, 1, Cp), lambda n, m: (n, 0, 0)),
        compiler_params=pltpu.CompilerParams(
            dimension_semantics=("parallel", "arbitrary")),
    )(x.reshape(N, HW, Cin), w.astype(jnp.bfloat16),
      scale.reshape(1, Cp), bias.reshape(1, Cp))
    return out[:, 0, :Cout]


# ----------------------------------------------------------------------------
# Deterministic parameter construction (mirrors the PyTorch __init__ shapes)
# ----------------------------------------------------------------------------
def make_divisible(v, divisor, min_value=None):
    if min_value is None:
        min_value = divisor
    new_v = max(min_value, int(v + divisor / 2) // divisor * divisor)
    if new_v < 0.9 * v:
        new_v += divisor
    return new_v


class KeyGen:
    def __init__(self, key):
        self.key = key

    def next(self):
        self.key, sub = jax.random.split(self.key)
        return sub


def conv_w(kg, kh, kw, cin, cout):
    return jax.random.normal(kg.next(), (kh, kw, cin, cout), jnp.float32) * 0.1


def dw_w(kg, k, c):
    return jax.random.normal(kg.next(), (k, k, c), jnp.float32) * 0.1


def bn_params(kg, c, eps=1e-5):
    gamma = 1.0 + 0.1 * jax.random.normal(kg.next(), (c,), jnp.float32)
    beta = 0.1 * jax.random.normal(kg.next(), (c,), jnp.float32)
    mean = 0.1 * jax.random.normal(kg.next(), (c,), jnp.float32)
    var = 1.0 + 0.1 * jax.random.uniform(kg.next(), (c,), jnp.float32)
    scale = gamma / jnp.sqrt(var + eps)
    bias = beta - mean * scale
    return scale, bias


def ghost_module_init(kg, inp, oup, relu):
    init_ch = math.ceil(oup / 2)           # ratio=2
    assert 2 * init_ch == oup              # make_divisible(...,4) => oup even
    p = {"relu": relu, "oup": oup}
    p["primary_w"] = conv_w(kg, 1, 1, inp, init_ch).reshape(inp, init_ch)
    p["primary_scale"], p["primary_bias"] = bn_params(kg, init_ch)
    p["cheap_w"] = dw_w(kg, 3, init_ch)    # depthwise (groups = init_ch)
    p["cheap_scale"], p["cheap_bias"] = bn_params(kg, init_ch)
    return p


def ghost_bottleneck_init(kg, in_chs, mid_chs, out_chs, dw_k, stride):
    p = {"stride": stride}
    p["ghost1"] = ghost_module_init(kg, in_chs, mid_chs, relu=True)
    if stride > 1:
        p["conv_dw_w"] = dw_w(kg, dw_k, mid_chs)
        p["bn_dw_scale"], p["bn_dw_bias"] = bn_params(kg, mid_chs)
    # TODO(synk): SEBlock (rd_ratio > 0) not implemented - configs use rd_ratio=0.
    p["ghost2"] = ghost_module_init(kg, mid_chs, out_chs, relu=False)
    if not (in_chs == out_chs and stride == 1):
        p["sc_dw_w"] = dw_w(kg, dw_k, in_chs)
        p["sc_bn1_scale"], p["sc_bn1_bias"] = bn_params(kg, in_chs)
        p["sc_pw_w"] = conv_w(kg, 1, 1, in_chs, out_chs).reshape(in_chs, out_chs)
        p["sc_bn2_scale"], p["sc_bn2_bias"] = bn_params(kg, out_chs)
    return p


def ghostnet_init(kg, in_channels, num_classes, multiplier, cfgs, thumbnail):
    front_s = 1 if thumbnail else 2
    inp = make_divisible(16 * multiplier, 4)
    p = {"stem_stride": front_s}
    p["stem_w"] = conv_w(kg, 3, 3, in_channels, inp)
    p["stem_scale"], p["stem_bias"] = bn_params(kg, inp)
    stages = []
    t = 16
    for cfg in cfgs:
        stage = []
        for k, t, c, rd_ratio, s in cfg:
            oup = make_divisible(c * multiplier, 4)
            stage.append(ghost_bottleneck_init(
                kg, inp, make_divisible(t * multiplier, 4), oup, k, s))
            inp = oup
        stages.append(stage)
    p["stages"] = stages
    head_out = make_divisible(t * multiplier, 4)
    p["head_w"] = conv_w(kg, 1, 1, inp, head_out).reshape(inp, head_out)
    p["head_scale"], p["head_bias"] = bn_params(kg, head_out)
    p["fc1_w"] = jax.random.normal(kg.next(), (head_out, 1280), jnp.float32) * 0.05
    p["fc1_b"] = jnp.full((1280,), 0.01, jnp.float32)
    p["fc2_w"] = jax.random.normal(kg.next(), (1280, num_classes), jnp.float32) * 0.05
    p["fc2_b"] = jnp.zeros((num_classes,), jnp.float32)
    return p


# ----------------------------------------------------------------------------
# forward pass
# ----------------------------------------------------------------------------
def ghost_bottleneck_fwd(p, x):
    residual = x
    y = ghost_module_fwd(p["ghost1"], x)
    if p["stride"] > 1:
        y = dwconv_bn_act(y, p["conv_dw_w"], p["bn_dw_scale"], p["bn_dw_bias"],
                          stride=p["stride"], relu=False)
    if "sc_dw_w" in p:
        sc = dwconv_bn_act(residual, p["sc_dw_w"], p["sc_bn1_scale"],
                           p["sc_bn1_bias"], stride=p["stride"], relu=False)
        sc = conv1x1_bn_act(sc, p["sc_pw_w"], p["sc_bn2_scale"],
                            p["sc_bn2_bias"], relu=False)
    else:
        sc = residual
    # residual add fused into the ghost2 kernel epilogue
    return ghost_module_fwd(p["ghost2"], y, residual=sc)


def ghostnet_fwd(p, x_nchw):
    # layout: convert PyTorch NCHW input to NHWC once; all kernels run NHWC.
    x = jnp.transpose(x_nchw, (0, 2, 3, 1)).astype(jnp.float32)
    x = conv3x3_bn_act(x, p["stem_w"], p["stem_scale"], p["stem_bias"],
                       stride=p["stem_stride"], relu=True)
    for stage in p["stages"]:
        for bp in stage:
            x = ghost_bottleneck_fwd(bp, x)
    # head 1x1 conv + BN + ReLU fused with AdaptiveAvgPool2d((1,1))
    x = head_conv_pool(x, p["head_w"], p["head_scale"], p["head_bias"], relu=True)
    ones1 = jnp.ones((p["fc1_w"].shape[1],), jnp.float32)
    x = matmul_bn_act(x, p["fc1_w"], ones1, p["fc1_b"], relu=True)
    # Dropout is identity at inference.
    ones2 = jnp.ones((p["fc2_w"].shape[1],), jnp.float32)
    x = matmul_bn_act(x, p["fc2_w"], ones2, p["fc2_b"], relu=False)
    return x


# ----------------------------------------------------------------------------
if __name__ == "__main__":
    # small GhostNet config: (k, t, c, rd_ratio, s)
    cfgs = [
        [[3, 16, 16, 0, 1]],   # identity-shortcut bottleneck (fused residual)
        [[3, 48, 24, 0, 2]],   # strided bottleneck (phase-decomposed dw conv)
    ]
    key = jax.random.PRNGKey(0)
    kg = KeyGen(key)
    params = ghostnet_init(kg, in_channels=3, num_classes=10, multiplier=1.0,
                           cfgs=cfgs, thumbnail=True)

    x = jax.random.normal(jax.random.PRNGKey(0), (2, 3, 16, 16), jnp.float32)
    out = ghostnet_fwd(params, x)
    out = jax.block_until_ready(out)
    assert out.shape == (2, 10), out.shape
    assert bool(jnp.all(jnp.isfinite(out)))
    print("KERNEL_OK")
</pallas_src>

<mosaic_0001>
module attributes {stable_mosaic.version = 11 : i64} {
  func.func @_stem_kernel(%arg0: i32, %arg1: memref<1x16x16x3xf32, #tpu.memory_space<vmem>>, %arg2: memref<27x16xbf16, #tpu.memory_space<vmem>>, %arg3: memref<1x16xf32, #tpu.memory_space<vmem>>, %arg4: memref<1x16xf32, #tpu.memory_space<vmem>>, %arg5: memref<1x16x16x16xf32, #tpu.memory_space<vmem>>, %arg6: memref<18x18x3xf32, #tpu.memory_space<vmem>>) attributes {dimension_semantics = [#tpu.dimension_semantics<parallel>], iteration_bounds = array<i64: 2>, scalar_prefetch = 0 : i64, scratch_operands = 1 : i64, tpu.core_type = #tpu.core_type<tc>, window_params = [{transform_indices = @transform_0, window_bounds = array<i64: 1, 16, 16, 3>}, {pipeline_mode = #tpu.pipeline_mode<synchronous>, transform_indices = @transform_1, window_bounds = array<i64: 27, 16>}, {pipeline_mode = #tpu.pipeline_mode<synchronous>, transform_indices = @transform_2, window_bounds = array<i64: 1, 16>}, {pipeline_mode = #tpu.pipeline_mode<synchronous>, transform_indices = @transform_3, window_bounds = array<i64: 1, 16>}, {transform_indices = @transform_4, window_bounds = array<i64: 1, 16, 16, 16>}]} {
    %cst = arith.constant 0.000000e+00 : f32
    %0 = vector.broadcast %cst : f32 to vector<18x18x3xf32>
    %c0 = arith.constant 0 : index
    %c0_0 = arith.constant 0 : index
    %c0_1 = arith.constant 0 : index
    %1 = vector.load %arg6[%c0, %c0_0, %c0_1] : memref<18x18x3xf32, #tpu.memory_space<vmem>>, vector<18x18x3xf32>
    tpu.vector_store %arg6[%c0, %c0_0, %c0_1], %0 {strides = array<i32>} : memref<18x18x3xf32, #tpu.memory_space<vmem>>, vector<18x18x3xf32>,
    %c0_2 = arith.constant 0 : index
    %c0_3 = arith.constant 0 : index
    %c0_4 = arith.constant 0 : index
    %c0_5 = arith.constant 0 : index
    %2 = vector.load %arg1[%c0_2, %c0_3, %c0_4, %c0_5] : memref<1x16x16x3xf32, #tpu.memory_space<vmem>>, vector<1x16x16x3xf32>
    %3 = vector.shape_cast %2 : vector<1x16x16x3xf32> to vector<16x16x3xf32>
    %c1 = arith.constant 1 : index
    %c1_6 = arith.constant 1 : index
    %c0_7 = arith.constant 0 : index
    %4 = vector.load %arg6[%c1, %c1_6, %c0_7] : memref<18x18x3xf32, #tpu.memory_space<vmem>>, vector<16x16x3xf32>
    tpu.vector_store %arg6[%c1, %c1_6, %c0_7], %3 {strides = array<i32>} : memref<18x18x3xf32, #tpu.memory_space<vmem>>, vector<16x16x3xf32>,
    %c0_8 = arith.constant 0 : index
    %c0_9 = arith.constant 0 : index
    %c0_10 = arith.constant 0 : index
    %5 = vector.load %arg6[%c0_8, %c0_9, %c0_10] : memref<18x18x3xf32, #tpu.memory_space<vmem>>, vector<16x16x3xf32>
    %c0_11 = arith.constant 0 : index
    %c1_12 = arith.constant 1 : index
    %c0_13 = arith.constant 0 : index
    %6 = vector.load %arg6[%c0_11, %c1_12, %c0_13] : memref<18x18x3xf32, #tpu.memory_space<vmem>>, vector<16x16x3xf32>
    %c0_14 = arith.constant 0 : index
    %c2 = arith.constant 2 : index
    %c0_15 = arith.constant 0 : index
    %7 = vector.load %arg6[%c0_14, %c2, %c0_15] : memref<18x18x3xf32, #tpu.memory_space<vmem>>, vector<16x16x3xf32>
    %c1_16 = arith.constant 1 : index
    %c0_17 = arith.constant 0 : index
    %c0_18 = arith.constant 0 : index
    %8 = vector.load %arg6[%c1_16, %c0_17, %c0_18] : memref<18x18x3xf32, #tpu.memory_space<vmem>>, vector<16x16x3xf32>
    %c1_19 = arith.constant 1 : index
    %c1_20 = arith.constant 1 : index
    %c0_21 = arith.constant 0 : index
    %9 = vector.load %arg6[%c1_19, %c1_20, %c0_21] : memref<18x18x3xf32, #tpu.memory_space<vmem>>, vector<16x16x3xf32>
    %c1_22 = arith.constant 1 : index
    %c2_23 = arith.constant 2 : index
    %c0_24 = arith.constant 0 : index
    %10 = vector.load %arg6[%c1_22, %c2_23, %c0_24] : memref<18x18x3xf32, #tpu.memory_space<vmem>>, vector<16x16x3xf32>
    %c2_25 = arith.constant 2 : index
    %c0_26 = arith.constant 0 : index
    %c0_27 = arith.constant 0 : index
    %11 = vector.load %arg6[%c2_25, %c0_26, %c0_27] : memref<18x18x3xf32, #tpu.memory_space<vmem>>, vector<16x16x3xf32>
    %c2_28 = arith.constant 2 : index
    %c1_29 = arith.constant 1 : index
    %c0_30 = arith.constant 0 : index
    %12 = vector.load %arg6[%c2_28, %c1_29, %c0_30] : memref<18x18x3xf32, #tpu.memory_space<vmem>>, vector<16x16x3xf32>
    %c2_31 = arith.constant 2 : index
    %c2_32 = arith.constant 2 : index
    %c0_33 = arith.constant 0 : index
    %13 = vector.load %arg6[%c2_31, %c2_32, %c0_33] : memref<18x18x3xf32, #tpu.memory_space<vmem>>, vector<16x16x3xf32>
    %14 = tpu.concatenate %5, %6, %7, %8, %9, %10, %11, %12, %13 in 2 : vector<16x16x3xf32>, vector<16x16x3xf32>, vector<16x16x3xf32>, vector<16x16x3xf32>, vector<16x16x3xf32>, vector<16x16x3xf32>, vector<16x16x3xf32>, vector<16x16x3xf32>, vector<16x16x3xf32> -> vector<16x16x27xf32>
    %15 = vector.shape_cast %14 : vector<16x16x27xf32> to vector<256x27xf32>
    %16 = arith.truncf %15 : vector<256x27xf32> to vector<256x27xbf16>
    %c0_34 = arith.constant 0 : index
    %c0_35 = arith.constant 0 : index
    %17 = vector.load %arg2[%c0_34, %c0_35] : memref<27x16xbf16, #tpu.memory_space<vmem>>, vector<27x16xbf16>
    %cst_36 = arith.constant dense<0.000000e+00> : vector<256x16xf32>
    %18 = tpu.matmul %16, %17, %cst_36 {dimension_numbers = #tpu.dot_dimension_numbers<[1], [0], [0], [1], [0, 0, 1, 1], [], []>} : vector<256x27xbf16>, vector<27x16xbf16>, vector<256x16xf32> -> vector<256x16xf32>
    %c0_37 = arith.constant 0 : index
    %c0_38 = arith.constant 0 : index
    %19 = vector.load %arg3[%c0_37, %c0_38] : memref<1x16xf32, #tpu.memory_space<vmem>>, vector<1x16xf32>
    %20 = vector.broadcast %19 : vector<1x16xf32> to vector<256x16xf32>
    %21 = arith.mulf %18, %20 : vector<256x16xf32>
    %c0_39 = arith.constant 0 : index
    %c0_40 = arith.constant 0 : index
    %22 = vector.load %arg4[%c0_39, %c0_40] : memref<1x16xf32, #tpu.memory_space<vmem>>, vector<1x16xf32>
    %23 = vector.broadcast %22 : vector<1x16xf32> to vector<256x16xf32>
    %24 = arith.addf %21, %23 : vector<256x16xf32>
    %cst_41 = arith.constant 0.000000e+00 : f32
    %25 = vector.broadcast %cst_41 : f32 to vector<256x16xf32>
    %26 = arith.maximumf %24, %25 : vector<256x16xf32>
    %27 = vector.shape_cast %26 : vector<256x16xf32> to vector<16x16x16xf32>
    %c0_42 = arith.constant 0 : index
    %c0_43 = arith.constant 0 : index
    %c0_44 = arith.constant 0 : index
    %c0_45 = arith.constant 0 : index
    %28 = vector.load %arg5[%c0_42, %c0_43, %c0_44, %c0_45] : memref<1x16x16x16xf32, #tpu.memory_space<vmem>>, vector<1x16x16x16xf32>
    %29 = vector.shape_cast %28 : vector<1x16x16x16xf32> to vector<16x16x16xf32>
    %30 = vector.shape_cast %27 : vector<16x16x16xf32> to vector<1x16x16x16xf32>
    tpu.vector_store %arg5[%c0_42, %c0_43, %c0_44, %c0_45], %30 {strides = array<i32>} : memref<1x16x16x16xf32, #tpu.memory_space<vmem>>, vector<1x16x16x16xf32>,
    return
  }
  func.func @transform_0(%arg0: i32) -> (i32, i32, i32, i32) {
    %c0_i32 = arith.constant 0 : i32
    %c0_i32_0 = arith.constant 0 : i32
    %c0_i32_1 = arith.constant 0 : i32
    %c0_i32_2 = arith.constant 0 : i32
    return %arg0, %c0_i32, %c0_i32_0, %c0_i32_1 : i32, i32, i32, i32
  }
  func.func @transform_1(%arg0: i32) -> (i32, i32) {
    %c0_i32 = arith.constant 0 : i32
    %c0_i32_0 = arith.constant 0 : i32
    %c0_i32_1 = arith.constant 0 : i32
    return %c0_i32, %c0_i32_0 : i32, i32
  }
  func.func @transform_2(%arg0: i32) -> (i32, i32) {
    %c0_i32 = arith.constant 0 : i32
    %c0_i32_0 = arith.constant 0 : i32
    %c0_i32_1 = arith.constant 0 : i32
    return %c0_i32, %c0_i32_0 : i32, i32
  }
  func.func @transform_3(%arg0: i32) -> (i32, i32) {
    %c0_i32 = arith.constant 0 : i32
    %c0_i32_0 = arith.constant 0 : i32
    %c0_i32_1 = arith.constant 0 : i32
    return %c0_i32, %c0_i32_0 : i32, i32
  }
  func.func @transform_4(%arg0: i32) -> (i32, i32, i32, i32) {
    %c0_i32 = arith.constant 0 : i32
    %c0_i32_0 = arith.constant 0 : i32
    %c0_i32_1 = arith.constant 0 : i32
    %c0_i32_2 = arith.constant 0 : i32
    return %arg0, %c0_i32, %c0_i32_0, %c0_i32_1 : i32, i32, i32, i32
  }
}

</mosaic_0001>

<bundles_post_ra>
// kernel: tpu_custom_call.1
= control target key start
LH: loop header
LB: loop body
LE: loop exit
PB: predicated region body
PF: predicated region fallthrough
CT: control target
= control target key end

     0   :  { %9 = vsyncpa [#allocation4], 0  ;;  %s4586_s0 = inlined_call_operand.vmem [shape: f32[2,16,16,3], index: 0, kind: input, shape index: {}]   ;;  %s4587_s1 = inlined_call_operand.vmem [shape: bf16[27,16], index: 1, kind: input, shape index: {}]   ;;  %s4588_s2 = inlined_call_operand.vmem [shape: f32[1,16], index: 2, kind: input, shape index: {}]   ;;  %s4589_s3 = inlined_call_operand.vmem [shape: f32[1,16], index: 3, kind: input, shape index: {}]   ;;  %s4590_s4 = inlined_call_operand.hbm [shape: f32[2,16,16,16], index: 4, kind: output, shape index: {}]  }
   0x1   :  { %11 = vsyncpa [#allocation4 + $0x1], 0  ;;  %s3125_s15 = smov 0   ;;  %s3127_s16 = smov 0  }
   0x2   :  { %s3129_s17 = smov 0   ;;  %s3131_s18 = smov 0  }
   0x3 LB: > { %s3146_s19 = sadd.s32 4294967295, %s3086_s18   ;;  %s2285_s20 = sadd.s32 4294967294, %s3086_s18   ;;  %s3086_s18 = sphi %s3131_s18, %s4659_s18   ;;  %s3082_s17 = sphi %s3129_s17, %s4658_s17   ;;  %s3078_s16 = sphi %s3127_s16, %s4657_s16   ;;  %s3074_s15 = sphi %s3125_s15, %s4656_s15  }
   0x4   : > { %s3150_s21 = sadd.s32 1, %s3086_s18   ;;  %s113_s22 = sadd.s32 1, %s3082_s17 }
   0x5   : > { %s110_s23 = ssub.s32 %s3086_s18, %s3150_s21  ;;  %p123_p0 = scmp.ne.s32.totalorder %s3082_s17, %s3078_s16 }
   0x6   : > { %p111_p1 = scmp.eq.s32.totalorder %s110_s23, 0  ;;  %p124_p2 = scmp.eq.s32.totalorder %s3146_s19, 1 }
   0x7   : > { %p129_p3 = scmp.ne.s32.totalorder %s3078_s16, %s3074_s15  ;;  %p130_p4 = scmp.eq.s32.totalorder %s2285_s20, 1 }
   0x8   : > { %s3161_s24 = scalar_select %p111_p1, %s3082_s17, %s113_s22  }
   0x9   : > { %p3163_p5 = por %p124_p2, %p123_p0  ;;  %p3167_p6 = por %p130_p4, %p129_p3 }
   0xa   : > { %p2288_p7 = scmp.ge.s32.totalorder %s3086_s18, 1  ;;  %p165_p8 = scmp.lt.s32.totalorder %s3086_s18, 3 }
   0xc   : > { %p166_p9 = pnand %p2288_p7, %p165_p8 }
   0xe   : > { %169 = sbr.rel (%p166_p9) target bundleno = 687 (0x2af), region = 36 }
  0x13   : > { %vm197_vm0 = vcmask 23552   ;;  %vm200_vm1 = vcmask 17408   ;;  %v3088_v0 = vmov 0.0   ;;  %s3089_s27 = smov 3   ;;  %p191_p10 = scmp.lt.s32.totalorder %s3146_s19, 1  ;;  %vm1663_vm2 = vcmask 48128  }
  0x14   : > { %198 = vst.msk [vmem:[#allocation2] sm:$0xff] %vm197_vm0, %v3088_v0  ;;  %s3090_s7 = smov 6   ;;  %s3091_s8 = smov 9   ;;  %vm1696_vm3 = vcmask 72704   ;;  %vm1729_vm4 = vcmask 97280   ;;  %vm1762_vm5 = vcmask 121856  }
  0x15   : > { %199 = vst.msk [vmem:[#allocation2 + $0x8] sm:$0xff] %vm197_vm0, %v3088_v0  ;;  %s192_s28 = scalar_select %p191_p10, %s3146_s19, 1  ;;  %vm1795_vm6 = vcmask 146432   ;;  %vm1974_vm7 = vcmask 1044480   ;;  %vm1975_vm8 = vcmask 1045504   ;;  %vm1861_vm9 = vcmask 195584  }
  0x16   : > { %201 = vst.msk [vmem:[#allocation2 + $0x10] sm:$0x3] %vm200_vm1, %v3088_v0  ;;  %s3092_s9 = smov 12   ;;  %s3093_s10 = smov 15   ;;  %vm1828_vm10 = vcmask 171008   ;;  %vm1925_vm11 = vcmask 220160  }
  0x17   : > { %202 = vst.msk [vmem:[#allocation2 + $0x18] sm:$0xff] %vm197_vm0, %v3088_v0  ;;  %s2321_s29 = sshll.u32 %s192_s28, 8  ;;  %s3094_s11 = smov 18   ;;  %vm2174_vm12 = vcmask 130048  }
  0x18   : > { %203 = vst.msk [vmem:[#allocation2 + $0x20] sm:$0xff] %vm197_vm0, %v3088_v0  ;;  %s3277_s6 = scalar_lea.vmem %s4586_s0, %s2321_s29  ;;  %s3095_s12 = smov 21  }
  0x19   : > { %204 = vst.msk [vmem:[#allocation2 + $0x28] sm:$0x3] %vm200_vm1, %v3088_v0  ;;  %v259_v4 = vld [vmem:[%s3277_s6 + $0x30] sm:$0xff]  ;;  %v260_v5 = vld [vmem:[%s3277_s6 + $0x38] sm:$0xff]  ;;  %v253_v8 = vld [vmem:[%s3277_s6] sm:$0xff]  ;;  %s3096_s13 = smov 24  }
  0x1a   : > { %205 = vst.msk [vmem:[#allocation2 + $0x30] sm:$0xff] %vm197_vm0, %v3088_v0  ;;  %v255_v6 = vld [vmem:[%s3277_s6 + $0x10] sm:$0xff]  ;;  %v256_v7 = vld [vmem:[%s3277_s6 + $0x18] sm:$0xff]  ;;  %v254_v9 = vld [vmem:[%s3277_s6 + $0x8] sm:$0xff]  ;;  %s188_s5 = sand.u32 1, %s3078_s16   ;;  %s3044_s29 = scalar_lea.hbm %s4590_s4, 512 }
  0x1b   : > { %206 = vst.msk [vmem:[#allocation2 + $0x38] sm:$0xff] %vm197_vm0, %v3088_v0  ;;  %v261_v10 = vld [vmem:[%s3277_s6 + $0x40] sm:$0xff]  ;;  %v262_v11 = vld [vmem:[%s3277_s6 + $0x48] sm:$0xff]  ;;  %v263_v15 = vld [vmem:[%s3277_s6 + $0x50] sm:$0xff]  ;;  %s2208_s20 = scalar_lea.sflag [#allocation4], %s188_s5 }
  0x1c   : > { %v350_v1 = vld [vmem:[#allocation2 + $0x1] sm:$0xff]  ;;  %207 = vst.msk [vmem:[#allocation2 + $0x40] sm:$0x3] %vm200_vm1, %v3088_v0  ;;  %v264_v17 = vld [vmem:[%s3277_s6 + $0x58] sm:$0xff]  ;;  %v267_v20 = vld [vmem:[%s3277_s6 + $0x70] sm:$0xff] }
  0x1d   : > { %v351_v2 = vld [vmem:[#allocation2 + $0x9] sm:$0xff]  ;;  %208 = vst.msk [vmem:[#allocation2 + $0x48] sm:$0xff] %vm197_vm0, %v3088_v0  ;;  %v257_v12 = vld [vmem:[%s3277_s6 + $0x20] sm:$0xff]  ;;  %v268_v22 = vld [vmem:[%s3277_s6 + $0x78] sm:$0xff] }
  0x1e   : > { %v2382_v3 = vpack.i.bf16 %v351_v2, %v350_v1  ;;  %209 = vst.msk [vmem:[#allocation2 + $0x50] sm:$0xff] %vm197_vm0, %v3088_v0  ;;  %v258_v13 = vld [vmem:[%s3277_s6 + $0x28] sm:$0xff]  ;;  %v265_v25 = vld [vmem:[%s3277_s6 + $0x60] sm:$0xff]  ;;  %v271_v40 = vld [vmem:[%s3277_s6 + $0x90] sm:$0xff] }
  0x1f   : > { %210 = vst.msk [vmem:[#allocation2 + $0x58] sm:$0x3] %vm200_vm1, %v3088_v0  ;;  %v266_v27 = vld [vmem:[%s3277_s6 + $0x68] sm:$0xff]  ;;  %v269_v30 = vld [vmem:[%s3277_s6 + $0x80] sm:$0xff]  ;;  %v272_v42 = vld [vmem:[%s3277_s6 + $0x98] sm:$0xff] }
  0x20   : > { %2383 = vrot.lane.b32.xlu0 %v2382_v3, %s3089_s27  ;;  %211 = vst.msk [vmem:[#allocation2 + $0x60] sm:$0xff] %vm197_vm0, %v3088_v0  ;;  %v270_v32 = vld [vmem:[%s3277_s6 + $0x88] sm:$0xff]  ;;  %v273_v35 = vld [vmem:[%s3277_s6 + $0xa0] sm:$0xff]  ;;  %v275_v44 = vld [vmem:[%s3277_s6 + $0xb0] sm:$0xff] }
  0x21   : > { %212 = vst.msk [vmem:[#allocation2 + $0x68] sm:$0xff] %vm197_vm0, %v3088_v0  ;;  %v274_v37 = vld [vmem:[%s3277_s6 + $0xa8] sm:$0xff]  ;;  %v276_v47 = vld [vmem:[%s3277_s6 + $0xb8] sm:$0xff]  ;;  %v279_v48 = vld [vmem:[%s3277_s6 + $0xd0] sm:$0xff] }
  0x22   : > { %213 = vst.msk [vmem:[#allocation2 + $0x70] sm:$0x3] %vm200_vm1, %v3088_v0  ;;  %v280_v51 = vld [vmem:[%s3277_s6 + $0xd8] sm:$0xff]  ;;  %v277_v53 = vld [vmem:[%s3277_s6 + $0xc0] sm:$0xff]  ;;  %v278_v56 = vld [vmem:[%s3277_s6 + $0xc8] sm:$0xff] }
  0x23   : > { %214 = vst.msk [vmem:[#allocation2 + $0x78] sm:$0xff] %vm197_vm0, %v3088_v0  ;;  %v281_v58 = vld [vmem:[%s3277_s6 + $0xe0] sm:$0xff]  ;;  %v282_v59 = vld [vmem:[%s3277_s6 + $0xe8] sm:$0xff] }
  0x24   : > { %215 = vst.msk [vmem:[#allocation2 + $0x80] sm:$0xff] %vm197_vm0, %v3088_v0 }
  0x25   : > { %216 = vst.msk [vmem:[#allocation2 + $0x88] sm:$0x3] %vm200_vm1, %v3088_v0 }
  0x26   : > { %217 = vst.msk [vmem:[#allocation2 + $0x90] sm:$0xff] %vm197_vm0, %v3088_v0 }
  0x27   : > { %218 = vst.msk [vmem:[#allocation2 + $0x98] sm:$0xff] %vm197_vm0, %v3088_v0 }
  0x28   : > { %219 = vst.msk [vmem:[#allocation2 + $0xa0] sm:$0x3] %vm200_vm1, %v3088_v0 }
  0x29   : > { %220 = vst.msk [vmem:[#allocation2 + $0xa8] sm:$0xff] %vm197_vm0, %v3088_v0 }
  0x2a   : > { %221 = vst.msk [vmem:[#allocation2 + $0xb0] sm:$0xff] %vm197_vm0, %v3088_v0 }
  0x2b   : > { %222 = vst.msk [vmem:[#allocation2 + $0xb8] sm:$0x3] %vm200_vm1, %v3088_v0 }
  0x2c   : > { %223 = vst.msk [vmem:[#allocation2 + $0xc0] sm:$0xff] %vm197_vm0, %v3088_v0 }
  0x2d   : > { %224 = vst.msk [vmem:[#allocation2 + $0xc8] sm:$0xff] %vm197_vm0, %v3088_v0 }
  0x2e   : > { %225 = vst.msk [vmem:[#allocation2 + $0xd0] sm:$0x3] %vm200_vm1, %v3088_v0 }
  0x2f   : > { %226 = vst.msk [vmem:[#allocation2 + $0xd8] sm:$0xff] %vm197_vm0, %v3088_v0 }
  0x30   : > { %227 = vst.msk [vmem:[#allocation2 + $0xe0] sm:$0xff] %vm197_vm0, %v3088_v0 }
  0x31   : > { %228 = vst.msk [vmem:[#allocation2 + $0xe8] sm:$0x3] %vm200_vm1, %v3088_v0 }
  0x32   : > { %229 = vst.msk [vmem:[#allocation2 + $0xf0] sm:$0xff] %vm197_vm0, %v3088_v0 }
  0x33   : > { %230 = vst.msk [vmem:[#allocation2 + $0xf8] sm:$0xff] %vm197_vm0, %v3088_v0 }
  0x34   : > { %231 = vst.msk [vmem:[#allocation2 + $0x100] sm:$0x3] %vm200_vm1, %v3088_v0 }
  0x35   : > { %232 = vst.msk [vmem:[#allocation2 + $0x108] sm:$0xff] %vm197_vm0, %v3088_v0 }
  0x36   : > { %233 = vst.msk [vmem:[#allocation2 + $0x110] sm:$0xff] %vm197_vm0, %v3088_v0 }
  0x37   : > { %234 = vst.msk [vmem:[#allocation2 + $0x118] sm:$0x3] %vm200_vm1, %v3088_v0 }
  0x38   : > { %235 = vst.msk [vmem:[#allocation2 + $0x120] sm:$0xff] %vm197_vm0, %v3088_v0 }
  0x39   : > { %236 = vst.msk [vmem:[#allocation2 + $0x128] sm:$0xff] %vm197_vm0, %v3088_v0 }
  0x3a   : > { %237 = vst.msk [vmem:[#allocation2 + $0x130] sm:$0x3] %vm200_vm1, %v3088_v0 }
  0x3b   : > { %238 = vst.msk [vmem:[#allocation2 + $0x138] sm:$0xff] %vm197_vm0, %v3088_v0 }
  0x3c   : > { %239 = vst.msk [vmem:[#allocation2 + $0x140] sm:$0xff] %vm197_vm0, %v3088_v0 }
  0x3d   : > { %240 = vst.msk [vmem:[#allocation2 + $0x148] sm:$0x3] %vm200_vm1, %v3088_v0 }
  0x3e   : > { %241 = vst.msk [vmem:[#allocation2 + $0x150] sm:$0xff] %vm197_vm0, %v3088_v0 }
  0x3f   : > { %242 = vst.msk [vmem:[#allocation2 + $0x158] sm:$0xff] %vm197_vm0, %v3088_v0 }
  0x40   : > { %243 = vst.msk [vmem:[#allocation2 + $0x160] sm:$0x3] %vm200_vm1, %v3088_v0 }
  0x41   : > { %244 = vst.msk [vmem:[#allocation2 + $0x168] sm:$0xff] %vm197_vm0, %v3088_v0 }
  0x42   : > { %245 = vst.msk [vmem:[#allocation2 + $0x170] sm:$0xff] %vm197_vm0, %v3088_v0 }
  0x43   : > { %246 = vst.msk [vmem:[#allocation2 + $0x178] sm:$0x3] %vm200_vm1, %v3088_v0 }
  0x44   : > { %247 = vst.msk [vmem:[#allocation2 + $0x180] sm:$0xff] %vm197_vm0, %v3088_v0 }
  0x45   : > { %248 = vst.msk [vmem:[#allocation2 + $0x188] sm:$0xff] %vm197_vm0, %v3088_v0 }
  0x46   : > { %249 = vst.msk [vmem:[#allocation2 + $0x190] sm:$0x3] %vm200_vm1, %v3088_v0 }
  0x47   : > { %250 = vst.msk [vmem:[#allocation2 + $0x198] sm:$0xff] %vm197_vm0, %v3088_v0 }
  0x48   : > { %251 = vst.msk [vmem:[#allocation2 + $0x1a0] sm:$0xff] %vm197_vm0, %v3088_v0 }
  0x49   : > { %252 = vst.msk [vmem:[#allocation2 + $0x1a8] sm:$0x3] %vm200_vm1, %v3088_v0 }
  0x4a   : > { %292 = vst.msk [vmem:[#allocation2 + $0x61] sm:$0xff] %vm197_vm0, %v259_v4 }
  0x4b   : > { %293 = vst.msk [vmem:[#allocation2 + $0x69] sm:$0xff] %vm197_vm0, %v260_v5 }
  0x4c   : > { %288 = vst.msk [vmem:[#allocation2 + $0x31] sm:$0xff] %vm197_vm0, %v255_v6 }
  0x4d   : > { %289 = vst.msk [vmem:[#allocation2 + $0x39] sm:$0xff] %vm197_vm0, %v256_v7 }
  0x4e   : > { %286 = vst.msk [vmem:[#allocation2 + $0x19] sm:$0xff] %vm197_vm0, %v253_v8 }
  0x4f   : > { %287 = vst.msk [vmem:[#allocation2 + $0x21] sm:$0xff] %vm197_vm0, %v254_v9 }
  0x50   : > { %294 = vst.msk [vmem:[#allocation2 + $0x79] sm:$0xff] %vm197_vm0, %v261_v10 }
  0x51   : > { %v358_v14 = vld [vmem:[#allocation2 + $0x61] sm:$0xff]  ;;  %295 = vst.msk [vmem:[#allocation2 + $0x81] sm:$0xff] %vm197_vm0, %v262_v11 }
  0x52   : > { %v359_v16 = vld [vmem:[#allocation2 + $0x69] sm:$0xff]  ;;  %290 = vst.msk [vmem:[#allocation2 + $0x49] sm:$0xff] %vm197_vm0, %v257_v12 }
  0x53   : > { %v3310_v18 = vpack.i.bf16 %v359_v16, %v358_v14  ;;  %v354_v19 = vld [vmem:[#allocation2 + $0x31] sm:$0xff]  ;;  %291 = vst.msk [vmem:[#allocation2 + $0x51] sm:$0xff] %vm197_vm0, %v258_v13 }
  0x54   : > { %v355_v21 = vld [vmem:[#allocation2 + $0x39] sm:$0xff]  ;;  %296 = vst.msk [vmem:[#allocation2 + $0x91] sm:$0xff] %vm197_vm0, %v263_v15 }
  0x55   : > { %2403 = vrot.lane.b32.xlu2 %v3310_v18, %s3089_s27  ;;  %v3318_v23 = vpack.i.bf16 %v355_v21, %v354_v19  ;;  %v352_v24 = vld [vmem:[#allocation2 + $0x19] sm:$0xff]  ;;  %297 = vst.msk [vmem:[#allocation2 + $0x99] sm:$0xff] %vm197_vm0, %v264_v17  ;;  %v382_v17 = vld [vmem:[#allocation2 + $0x2] sm:$0xff]  ;;  %v383_v19 = vld [vmem:[#allocation2 + $0xa] sm:$0xff] }
  0x56   : > { %v353_v26 = vld [vmem:[#allocation2 + $0x21] sm:$0xff]  ;;  %300 = vst.msk [vmem:[#allocation2 + $0xc1] sm:$0xff] %vm197_vm0, %v267_v20  ;;  %v386_v21 = vld [vmem:[#allocation2 + $0x32] sm:$0xff] }
  0x57   : > { %2393 = vrot.lane.b32.xlu1 %v3318_v23, %s3089_s27  ;;  %v3326_v28 = vpack.i.bf16 %v353_v26, %v352_v24  ;;  %v360_v29 = vld [vmem:[#allocation2 + $0x79] sm:$0xff]  ;;  %301 = vst.msk [vmem:[#allocation2 + $0xc9] sm:$0xff] %vm197_vm0, %v268_v22  ;;  %v385_v16 = vld [vmem:[#allocation2 + $0x22] sm:$0xff]  ;;  %v2462_v24 = vpack.i.bf16 %v383_v19, %v382_v17 }
  0x58   : > { %v361_v31 = vld [vmem:[#allocation2 + $0x81] sm:$0xff]  ;;  %298 = vst.msk [vmem:[#allocation2 + $0xa9] sm:$0xff] %vm197_vm0, %v265_v25  ;;  %v3474_v17 = vld [vmem:[#allocation2 + $0x38] sm:$0xff] }
  0x59   : > { %2388 = vrot.lane.b32.xlu0 %v3326_v28, %s3089_s27  ;;  %v3334_v33 = vpack.i.bf16 %v361_v31, %v360_v29  ;;  %v356_v34 = vld [vmem:[#allocation2 + $0x49] sm:$0xff]  ;;  %299 = vst.msk [vmem:[#allocation2 + $0xb1] sm:$0xff] %vm197_vm0, %v266_v27  ;;  %v384_v15 = vld [vmem:[#allocation2 + $0x1a] sm:$0xff] }
  0x5a   : > { %v357_v36 = vld [vmem:[#allocation2 + $0x51] sm:$0xff]  ;;  %302 = vst.msk [vmem:[#allocation2 + $0xd9] sm:$0xff] %vm197_vm0, %v269_v30  ;;  %v3409_v20 = vpack.i.bf16 %v385_v16, %v384_v15  ;;  %v387_v22 = vld [vmem:[#allocation2 + $0x3a] sm:$0xff]  ;;  %v390_v26 = vld [vmem:[#allocation2 + $0x62] sm:$0xff] }
  0x5b   : > { %v3340_v38 = vpack.i.bf16 %v357_v36, %v356_v34  ;;  %v362_v39 = vld [vmem:[#allocation2 + $0x91] sm:$0xff]  ;;  %303 = vst.msk [vmem:[#allocation2 + $0xe1] sm:$0xff] %vm197_vm0, %v270_v32  ;;  %v3413_v25 = vpack.i.bf16 %v387_v22, %v386_v21  ;;  %v392_v32 = vld [vmem:[#allocation2 + $0x7a] sm:$0xff]  ;;  %v393_v34 = vld [vmem:[#allocation2 + $0x82] sm:$0xff] }
  0x5c   : > { %v363_v41 = vld [vmem:[#allocation2 + $0x99] sm:$0xff]  ;;  %306 = vst.msk [vmem:[#allocation2 + $0x109] sm:$0xff] %vm197_vm0, %v273_v35  ;;  %v391_v27 = vld [vmem:[#allocation2 + $0x6a] sm:$0xff]  ;;  %v3424_v36 = vpack.i.bf16 %v393_v34, %v392_v32 }
  0x5d   : > { %2408 = vrot.lane.b32.xlu2 %v3334_v33, %s3089_s27  ;;  %v3348_v43 = vpack.i.bf16 %v363_v41, %v362_v39  ;;  %307 = vst.msk [vmem:[#allocation2 + $0x111] sm:$0xff] %vm197_vm0, %v274_v37  ;;  %v366_v45 = vld [vmem:[#allocation2 + $0xc1] sm:$0xff]  ;;  %v388_v29 = vld [vmem:[#allocation2 + $0x4a] sm:$0xff]  ;;  %v389_v30 = vld [vmem:[#allocation2 + $0x52] sm:$0xff]  ;;  %v3418_v31 = vpack.i.bf16 %v391_v27, %v390_v26 }
  0x5e   : > { %v367_v46 = vld [vmem:[#allocation2 + $0xc9] sm:$0xff]  ;;  %304 = vst.msk [vmem:[#allocation2 + $0xf1] sm:$0xff] %vm197_vm0, %v271_v40  ;;  %v3420_v35 = vpack.i.bf16 %v389_v30, %v388_v29  ;;  %v394_v40 = vld [vmem:[#allocation2 + $0x92] sm:$0xff]  ;;  %v395_v41 = vld [vmem:[#allocation2 + $0x9a] sm:$0xff] }
  0x5f   : > { %2398 = vrot.lane.b32.xlu1 %v3340_v38, %s3089_s27  ;;  %305 = vst.msk [vmem:[#allocation2 + $0xf9] sm:$0xff] %vm197_vm0, %v272_v42  ;;  %v364_v49 = vld [vmem:[#allocation2 + $0xa9] sm:$0xff]  ;;  %v3362_v52 = vpack.i.bf16 %v367_v46, %v366_v45  ;;  %v3432_v46 = vpack.i.bf16 %v395_v41, %v394_v40  ;;  %v420_v26 = vld [vmem:[#allocation2 + $0x60] sm:$0xff]  ;;  %v422_v34 = vld [vmem:[#allocation2 + $0x78] sm:$0xff] }
  0x60   : > { %v365_v50 = vld [vmem:[#allocation2 + $0xb1] sm:$0xff]  ;;  %308 = vst.msk [vmem:[#allocation2 + $0x121] sm:$0xff] %vm197_vm0, %v275_v44  ;;  %v398_v44 = vld [vmem:[#allocation2 + $0xc2] sm:$0xff] }
  0x61   : > { %2413 = vrot.lane.b32.xlu0 %v3348_v43, %s3089_s27  ;;  %309 = vst.msk [vmem:[#allocation2 + $0x129] sm:$0xff] %vm197_vm0, %v276_v47  ;;  %v368_v54 = vld [vmem:[#allocation2 + $0xd9] sm:$0xff]  ;;  %v3368_v57 = vpack.i.bf16 %v365_v50, %v364_v49  ;;  %v396_v37 = vld [vmem:[#allocation2 + $0xaa] sm:$0xff] }
  0x62   : > { %v369_v55 = vld [vmem:[#allocation2 + $0xe1] sm:$0xff]  ;;  %312 = vst.msk [vmem:[#allocation2 + $0x151] sm:$0xff] %vm197_vm0, %v279_v48  ;;  %v397_v39 = vld [vmem:[#allocation2 + $0xb2] sm:$0xff]  ;;  %v399_v45 = vld [vmem:[#allocation2 + $0xca] sm:$0xff] }
  0x63   : > { %313 = vst.msk [vmem:[#allocation2 + $0x159] sm:$0xff] %vm197_vm0, %v280_v51  ;;  %v3376_v60 = vpack.i.bf16 %v369_v55, %v368_v54  ;;  %v372_v61 = vld [vmem:[#allocation2 + $0x109] sm:$0xff]  ;;  %v3430_v42 = vpack.i.bf16 %v397_v39, %v396_v37  ;;  %v3436_v47 = vpack.i.bf16 %v399_v45, %v398_v44  ;;  %v400_v50 = vld [vmem:[#allocation2 + $0xda] sm:$0xff] }
  0x64   : > { %310 = vst.msk [vmem:[#allocation2 + $0x139] sm:$0xff] %vm197_vm0, %v277_v53  ;;  %v373_v62 = vld [vmem:[#allocation2 + $0x111] sm:$0xff]  ;;  %v401_v51 = vld [vmem:[#allocation2 + $0xe2] sm:$0xff] }
  0x65   : > { %2423 = vrot.lane.b32.xlu2 %v3362_v52, %s3089_s27  ;;  %311 = vst.msk [vmem:[#allocation2 + $0x141] sm:$0xff] %vm197_vm0, %v278_v56  ;;  %v370_v63 = vld [vmem:[#allocation2 + $0xf1] sm:$0xff]  ;;  %v3385_v1 = vpack.i.bf16 %v373_v62, %v372_v61  ;;  %v3444_v56 = vpack.i.bf16 %v401_v51, %v400_v50  ;;  %v421_v27 = vld [vmem:[#allocation2 + $0x68] sm:$0xff]  ;;  %v423_v37 = vld [vmem:[#allocation2 + $0x80] sm:$0xff] }
  0x66   : > { %314 = vst.msk [vmem:[#allocation2 + $0x169] sm:$0xff] %vm197_vm0, %v281_v58  ;;  %v371_v0 = vld [vmem:[#allocation2 + $0xf9] sm:$0xff]  ;;  %v404_v54 = vld [vmem:[#allocation2 + $0x10a] sm:$0xff]  ;;  %v3495_v32 = vpack.i.bf16 %v421_v27, %v420_v26  ;;  %v3503_v40 = vpack.i.bf16 %v423_v37, %v422_v34 }
  0x67   : > { %2418 = vrot.lane.b32.xlu1 %v3368_v57, %s3089_s27  ;;  %315 = vst.msk [vmem:[#allocation2 + $0x171] sm:$0xff] %vm197_vm0, %v282_v59  ;;  %v374_v2 = vld [vmem:[#allocation2 + $0x121] sm:$0xff]  ;;  %v3387_v4 = vpack.i.bf16 %v371_v0, %v370_v63  ;;  %v402_v48 = vld [vmem:[#allocation2 + $0xf2] sm:$0xff] }
  0x68   : > { %v375_v3 = vld [vmem:[#allocation2 + $0x129] sm:$0xff]  ;;  %4614 = vst [vmem:[#allocation6_spill] sm:$0xff] %v3430_v42  ;;  %v403_v49 = vld [vmem:[#allocation2 + $0xfa] sm:$0xff]  ;;  %v405_v55 = vld [vmem:[#allocation2 + $0x112] sm:$0xff] }
  0x69   : > { %2428 = vrot.lane.b32.xlu0 %v3376_v60, %s3089_s27  ;;  %v3391_v5 = vpack.i.bf16 %v375_v3, %v374_v2  ;;  %v378_v6 = vld [vmem:[#allocation2 + $0x151] sm:$0xff]  ;;  %v3442_v53 = vpack.i.bf16 %v403_v49, %v402_v48  ;;  %4616 = vst [vmem:[#allocation8_spill] sm:$0xff] %v3444_v56  ;;  %v3448_v58 = vpack.i.bf16 %v405_v55, %v404_v54  ;;  %v406_v62 = vld [vmem:[#allocation2 + $0x122] sm:$0xff] }
  0x6a   : > { %v379_v7 = vld [vmem:[#allocation2 + $0x159] sm:$0xff]  ;;  %v407_v63 = vld [vmem:[#allocation2 + $0x12a] sm:$0xff]  ;;  %4623 = vst [vmem:[#allocation15_spill] sm:$0xff] %v3495_v32 }
  0x6b   : > { %v376_v8 = vld [vmem:[#allocation2 + $0x139] sm:$0xff]  ;;  %v3397_v10 = vpack.i.bf16 %v379_v7, %v378_v6  ;;  %4615 = vst [vmem:[#allocation7_spill] sm:$0xff] %v3442_v53  ;;  %v3456_v6 = vpack.i.bf16 %v407_v63, %v406_v62  ;;  %v3472_v16 = vld [vmem:[#allocation2 + $0x30] sm:$0xff]  ;;  %v3489_v29 = vld [vmem:[#allocation2 + $0x48] sm:$0xff] }
  0x6c   : > { %v377_v9 = vld [vmem:[#allocation2 + $0x141] sm:$0xff]  ;;  %4617 = vst [vmem:[#allocation9_spill] sm:$0xff] %v3448_v58  ;;  %v410_v2 = vld [vmem:[#allocation2 + $0x152] sm:$0xff]  ;;  %v3482_v22 = vpack.i.bf16 %v3474_v17, %v3472_v16 }
  0x6d   : > { %2438 = vrot.lane.b32.xlu2 %v3385_v1, %s3089_s27  ;;  %v380_v11 = vld [vmem:[#allocation2 + $0x169] sm:$0xff]  ;;  %v3399_v13 = vpack.i.bf16 %v377_v9, %v376_v8  ;;  %v408_v59 = vld [vmem:[#allocation2 + $0x13a] sm:$0xff]  ;;  %4619 = vst [vmem:[#allocation11_spill] sm:$0xff] %v3456_v6 }
  0x6e   : > { %v381_v12 = vld [vmem:[#allocation2 + $0x171] sm:$0xff]  ;;  %v409_v61 = vld [vmem:[#allocation2 + $0x142] sm:$0xff]  ;;  %v411_v3 = vld [vmem:[#allocation2 + $0x15a] sm:$0xff]  ;;  %4622 = vst [vmem:[#allocation14_spill] sm:$0xff] %v3482_v22 }
  0x6f   : > { %2433 = vrot.lane.b32.xlu1 %v3387_v4, %s3089_s27  ;;  %v3403_v14 = vpack.i.bf16 %v381_v12, %v380_v11  ;;  %v3454_v0 = vpack.i.bf16 %v409_v61, %v408_v59  ;;  %v3460_v7 = vpack.i.bf16 %v411_v3, %v410_v2  ;;  %v3462_v8 = vld [vmem:[#allocation2 + $0x18] sm:$0xff]  ;;  %v3464_v9 = vld [vmem:[#allocation2 + $0x20] sm:$0xff]  ;;  %v412_v11 = vld [vmem:[#allocation2 + $0x16a] sm:$0xff]  ;;  %4625 = vst [vmem:[#allocation17_spill] sm:$0xff] %v3503_v40 }
  0x70   : > { %v413_v12 = vld [vmem:[#allocation2 + $0x172] sm:$0xff]  ;;  %v2542_v15 = vpack.i.bf16 %v3464_v9, %v3462_v8  ;;  %v3505_v41 = vld [vmem:[#allocation2 + $0xa8] sm:$0xff]  ;;  %v428_v61 = vld [vmem:[#allocation2 + $0xc0] sm:$0xff] }
  0x71   : > { %2443 = vrot.lane.b32.xlu0 %v3391_v5, %s3089_s27  ;;  %4618 = vst [vmem:[#allocation10_spill] sm:$0xff] %v3454_v0  ;;  %v3476_v19 = vpack.i.bf16 %v413_v12, %v412_v11  ;;  %v283_v21 = vld [vmem:[%s3277_s6 + $0xf0] sm:$0xff]  ;;  %v3513_v51 = vld [vmem:[#allocation2 + $0x98] sm:$0xff]  ;;  %v429_v62 = vld [vmem:[#allocation2 + $0xc8] sm:$0xff] }
  0x72   : > { %4620 = vst [vmem:[#allocation12_spill] sm:$0xff] %v3460_v7  ;;  %v3491_v30 = vld [vmem:[#allocation2 + $0x50] sm:$0xff]  ;;  %v3533_v2 = vpack.i.bf16 %v429_v62, %v428_v61  ;;  %v3537_v11 = vld [vmem:[#allocation2 + $0xf8] sm:$0xff] }
  0x73   : > { %4621 = vst [vmem:[#allocation13_spill] sm:$0xff] %v3476_v19  ;;  %v3499_v39 = vpack.i.bf16 %v3491_v30, %v3489_v29  ;;  %v3507_v44 = vld [vmem:[#allocation2 + $0xb0] sm:$0xff] }
  0x74   : > { %316 = vst.msk [vmem:[#allocation2 + $0x181] sm:$0xff] %vm197_vm0, %v283_v21  ;;  %v3511_v50 = vld [vmem:[#allocation2 + $0x90] sm:$0xff]  ;;  %v3519_v54 = vpack.i.bf16 %v3507_v44, %v3505_v41 }
  0x75   : > { %2453 = vrot.lane.b32.xlu2 %v3397_v10, %s3089_s27  ;;  %4624 = vst [vmem:[#allocation16_spill] sm:$0xff] %v3499_v39  ;;  %v3529_v63 = vpack.i.bf16 %v3513_v51, %v3511_v50  ;;  %v3535_v3 = vld [vmem:[#allocation2 + $0xf0] sm:$0xff] }
  0x76   : > { %4626 = vst [vmem:[#allocation18_spill] sm:$0xff] %v3519_v54 }
  0x77   : > { %2448 = vrot.lane.b32.xlu1 %v3399_v13, %s3089_s27  ;;  %4627 = vst [vmem:[#allocation19_spill] sm:$0xff] %v3529_v63 }
  0x78   : > { %4628 = vst [vmem:[#allocation20_spill] sm:$0xff] %v3533_v2 }
  0x79   : > { %2458 = vrot.lane.b32.xlu0 %v3403_v14, %s3089_s27 }
  0x7d   : > { %2468 = vrot.lane.b32.xlu2 %v3409_v20, %s3090_s7 }
  0x7f   : > { %2463 = vrot.lane.b32.xlu1 %v2462_v24, %s3090_s7  ;;  %v284_v24 = vld [vmem:[%s3277_s6 + $0xf8] sm:$0xff] }
  0x80   : > { %317 = vst.msk [vmem:[#allocation2 + $0x189] sm:$0xff] %vm197_vm0, %v284_v24  ;;  %v3541_v24 = vld [vmem:[#allocation2 + $0xd8] sm:$0xff] }
  0x81   : > { %2473 = vrot.lane.b32.xlu0 %v3413_v25, %s3090_s7 }
  0x85   : > { %2483 = vrot.lane.b32.xlu2 %v3418_v31, %s3090_s7 }
  0x87   : > { %2478 = vrot.lane.b32.xlu1 %v3420_v35, %s3090_s7 }
  0x89   : > { %2488 = vrot.lane.b32.xlu0 %v3424_v36, %s3090_s7 }
  0x8d   : > { %2498 = vrot.lane.b32.xlu2 %v3430_v42, %s3090_s7 }
  0x8f   : > { %2493 = vrot.lane.b32.xlu1 %v3432_v46, %s3090_s7 }
  0x91   : > { %2503 = vrot.lane.b32.xlu0 %v3436_v47, %s3090_s7 }
  0x95   : > { %2513 = vrot.lane.b32.xlu2 %v3442_v53, %s3090_s7 }
  0x97   : > { %2508 = vrot.lane.b32.xlu1 %v3444_v56, %s3090_s7 }
  0x99   : > { %2518 = vrot.lane.b32.xlu0 %v3448_v58, %s3090_s7 }
  0x9d   : > { %2528 = vrot.lane.b32.xlu2 %v3454_v0, %s3090_s7  ;;  %v441_v0 = vld [vmem:[#allocation2 + $0x158] sm:$0xff] }
  0x9f   : > { %2523 = vrot.lane.b32.xlu1 %v3456_v6, %s3090_s7  ;;  %v445_v6 = vld [vmem:[#allocation2 + $0x188] sm:$0xff] }
  0xa1   : > { %2533 = vrot.lane.b32.xlu0 %v3460_v7, %s3090_s7 }
  0xa5   : > { %2543 = vrot.lane.b32.xlu2 %v2542_v15, %s3091_s8 }
  0xa7   : > { %2538 = vrot.lane.b32.xlu1 %v3476_v19, %s3090_s7 }
  0xa9   : > { %2548 = vrot.lane.b32.xlu0 %v3482_v22, %s3091_s8 }
  0xad   : > { %2558 = vrot.lane.b32.xlu2 %v3495_v32, %s3091_s8  ;;  %v3565_v32 = vld [vmem:[#allocation2 + $0x140] sm:$0xff] }
  0xaf   : > { %2553 = vrot.lane.b32.xlu1 %v3499_v39, %s3091_s8  ;;  %v2404_v45 = vpop.permute.xlu2 %2403  ;;  %v3574_v39 = vpop.permute.xlu0 %2383 }
  0xb0   : > { %v2406_v48 = vunpack.i.h.bf16 %v2404_v45  ;;  %v2405_v49 = vunpack.i.l.bf16 %v2404_v45 }
  0xb1   : > { %2563 = vrot.lane.b32.xlu0 %v3503_v40, %s3091_s8  ;;  %v3571_v40 = vld [vmem:[#allocation2 + $0x128] sm:$0xff] }
  0xb2   : > { %v3522_v55 = vsel %vm197_vm0, %v420_v26, %v2405_v49  ;;  %v3525_v59 = vsel %vm197_vm0, %v421_v27, %v2406_v48  ;;  %v3543_v26 = vld [vmem:[#allocation2 + $0xe0] sm:$0xff]  ;;  %v3549_v27 = vpack.i.bf16 %v3537_v11, %v3535_v3  ;;  %v434_v49 = vld [vmem:[#allocation2 + $0x108] sm:$0xff]  ;;  %4632 = vst [vmem:[#allocation24_spill] sm:$0xff] %v3571_v40 }
  0xb4   : > { %4629 = vst [vmem:[#allocation21_spill] sm:$0xff] %v3549_v27 }
  0xb5   : > { %2573 = vrot.lane.b32.xlu2 %v3519_v54, %s3091_s8  ;;  %v435_v54 = vld [vmem:[#allocation2 + $0x110] sm:$0xff] }
  0xb7   : > { %2568 = vrot.lane.b32.xlu1 %v3529_v63, %s3091_s8  ;;  %v2409_v12 = vpop.permute.xlu2 %2408  ;;  %v3563_v63 = vld [vmem:[#allocation2 + $0x138] sm:$0xff] }
  0xb8   : > { %v2411_v15 = vunpack.i.h.bf16 %v2409_v12  ;;  %v2410_v21 = vunpack.i.l.bf16 %v2409_v12  ;;  %v3559_v12 = vpack.i.bf16 %v3543_v26, %v3541_v24 }
  0xb9   : > { %2578 = vrot.lane.b32.xlu0 %v3533_v2, %s3091_s8  ;;  %v2592_v2 = vpack.i.bf16 %v435_v54, %v434_v49 }
  0xba   : > { %v3552_v45 = vsel %vm197_vm0, %v423_v37, %v2411_v15  ;;  %v3555_v48 = vsel %vm197_vm0, %v422_v34, %v2410_v21  ;;  %4630 = vst [vmem:[#allocation22_spill] sm:$0xff] %v3559_v12  ;;  %v3569_v21 = vld [vmem:[#allocation2 + $0x120] sm:$0xff] }
  0xbb   : > { %4631 = vst [vmem:[#allocation23_spill] sm:$0xff] %v3569_v21 }
  0xbd   : > { %2588 = vrot.lane.b32.xlu2 %v3549_v27, %s3091_s8  ;;  %v2602_v27 = vpack.i.bf16 %v3565_v32, %v3563_v63 }
  0xbf   : > { %2583 = vrot.lane.b32.xlu1 %v3559_v12, %s3091_s8  ;;  %v2424_v37 = vpop.permute.xlu2 %2423  ;;  %v440_v12 = vld [vmem:[#allocation2 + $0x150] sm:$0xff] }
  0xc0   : > { %v2426_v34 = vunpack.i.h.bf16 %v2424_v37  ;;  %v2425_v15 = vunpack.i.l.bf16 %v2424_v37  ;;  %v2597_v37 = vpack.i.bf16 %v3571_v40, %v3569_v21  ;;  %v3587_v7 = vpack.i.bf16 %v441_v0, %v440_v12 }
  0xc1   : > { %2593 = vrot.lane.b32.xlu0 %v2592_v2, %s3091_s8  ;;  %v444_v2 = vld [vmem:[#allocation2 + $0x180] sm:$0xff] }
  0xc2   : > { %v3579_v22 = vsel %vm197_vm0, %v429_v62, %v2426_v34  ;;  %v3582_v19 = vsel %vm197_vm0, %v428_v61, %v2425_v15  ;;  %4633 = vst [vmem:[#allocation25_spill] sm:$0xff] %v3587_v7  ;;  %v3590_v34 = vld [vmem:[#allocation2 + $0x168] sm:$0xff]  ;;  %v3592_v61 = vld [vmem:[#allocation2 + $0x170] sm:$0xff]  ;;  %v2617_v21 = vpack.i.bf16 %v445_v6, %v444_v2 }
  0xc5   : > { %2603 = vrot.lane.b32.xlu2 %v2602_v27, %s3091_s8 }
  0xc7   : > { %2598 = vrot.lane.b32.xlu1 %v2597_v37, %s3091_s8  ;;  %v2439_v53 = vpop.permute.xlu2 %2438 }
  0xc8   : > { %v2441_v58 = vunpack.i.h.bf16 %v2439_v53  ;;  %v2440_v62 = vunpack.i.l.bf16 %v2439_v53  ;;  %v3606_v53 = vpack.i.bf16 %v3592_v61, %v3590_v34 }
  0xc9   : > { %v3594_v15 = vpop.permute.xlu1 %2393  ;;  %2608 = vrot.lane.b32.xlu0 %v3587_v7, %s3091_s8 }
  0xca   : > { %v3599_v27 = vsel %vm197_vm0, %v435_v54, %v2441_v58  ;;  %v3602_v40 = vsel %vm197_vm0, %v434_v49, %v2440_v62  ;;  %4634 = vst [vmem:[#allocation26_spill] sm:$0xff] %v3606_v53 }
  0xcb   : > { %v2389_v37 = vpop.permute.xlu0 %2388 }
  0xcc   : > { %v2390_v2 = vunpack.i.l.bf16 %v2389_v37 }
  0xcd   : > { %2618 = vrot.lane.b32.xlu2 %v2617_v21, %s3091_s8  ;;  %v2391_v21 = vunpack.i.h.bf16 %v2389_v37 }
  0xcf   : > { %2613 = vrot.lane.b32.xlu1 %v3606_v53, %s3091_s8  ;;  %v2454_v56 = vpop.permute.xlu2 %2453  ;;  %s2289_s8 = sshll.u32 %s188_s5, 8 }
  0xd0   : > { %v2456_v42 = vunpack.i.h.bf16 %v2454_v56  ;;  %v2455_v7 = vunpack.i.l.bf16 %v2454_v56 }
  0xd1   : > { %v3611_v6 = vpop.permute.xlu1 %2398  ;;  %2623 = vrot.lane.b32.xlu0 %v3326_v28, %s3092_s9 }
  0xd2   : > { %v3616_v58 = vsel %vm197_vm0, %v441_v0, %v2456_v42  ;;  %v3619_v54 = vsel %vm197_vm0, %v440_v12, %v2455_v7  ;;  %v1633_v42 = vsel %vm197_vm0, %v3462_v8, %v2390_v2  ;;  %v1634_v0 = vsel %vm197_vm0, %v3464_v9, %v2391_v21 }
  0xd3   : > { %v3621_v49 = vpop.permute.xlu0 %2413 }
  0xd5   : > { %2633 = vrot.lane.b32.xlu2 %v3340_v38, %s3092_s9 }
  0xd7   : > { %2628 = vrot.lane.b32.xlu1 %v3318_v23, %s3092_s9  ;;  %v2469_v56 = vpop.permute.xlu2 %2468 }
  0xd8   : > { %v2471_v62 = vunpack.i.h.bf16 %v2469_v56  ;;  %v2470_v28 = vunpack.i.l.bf16 %v2469_v56 }
  0xd9   : > { %v2419_v7 = vpop.permute.xlu1 %2418  ;;  %2638 = vrot.lane.b32.xlu0 %v3310_v18, %s3092_s9 }
  0xda   : > { %v3634_v12 = vsel %vm1663_vm2, %v1633_v42, %v2470_v28  ;;  %v3637_v38 = vsel %vm1663_vm2, %v1634_v0, %v2471_v62  ;;  %v2420_v62 = vunpack.i.l.bf16 %v2419_v7 }
  0xdb   : > { %v3639_v23 = vpop.permute.xlu0 %2428 }
  0xdd   : > { %2648 = vrot.lane.b32.xlu2 %v3348_v43, %s3092_s9  ;;  %v2421_v43 = vunpack.i.h.bf16 %v2419_v7 }
  0xdf   : > { %2643 = vrot.lane.b32.xlu1 %v3334_v33, %s3092_s9  ;;  %v2484_v8 = vpop.permute.xlu2 %2483 }
  0xe0   : > { %v2486_v9 = vunpack.i.h.bf16 %v2484_v8  ;;  %v2485_v37 = vunpack.i.l.bf16 %v2484_v8 }
  0xe1   : > { %v2434_v21 = vpop.permute.xlu1 %2433  ;;  %2653 = vrot.lane.b32.xlu0 %v3368_v57, %s3092_s9 }
  0xe2   : > { %v3649_v18 = vsel %vm1663_vm2, %v3525_v59, %v2486_v9  ;;  %v3653_v2 = vsel %vm1663_vm2, %v3522_v55, %v2485_v37  ;;  %v1646_v59 = vsel %vm197_vm0, %v3507_v44, %v2421_v43  ;;  %v1645_v55 = vsel %vm197_vm0, %v3505_v41, %v2420_v62  ;;  %v319_v37 = vld [vmem:[#allocation2 + $0x8] sm:$0xff]  ;;  %v318_v43 = vld [vmem:[#allocation2] sm:$0xff] }
  0xe3   : > { %v3655_v56 = vpop.permute.xlu0 %2443  ;;  %v2436_v7 = vunpack.i.h.bf16 %v2434_v21  ;;  %v2435_v8 = vunpack.i.l.bf16 %v2434_v21  ;;  %v2386_v44 = vunpack.i.h.bf16 %v3574_v39  ;;  %v2385_v41 = vunpack.i.l.bf16 %v3574_v39 }
  0xe4   : > { %v2395_v9 = vunpack.i.l.bf16 %v3594_v15 }
  0xe5   : > { %2663 = vrot.lane.b32.xlu2 %v3376_v60, %s3092_s9  ;;  %v1652_v21 = vsel %vm197_vm0, %v3537_v11, %v2436_v7  ;;  %v1632_v53 = vsel %vm197_vm0, %v319_v37, %v2386_v44  ;;  %v1631_v11 = vsel %vm197_vm0, %v318_v43, %v2385_v41 }
  0xe7   : > { %2658 = vrot.lane.b32.xlu1 %v3362_v52, %s3092_s9  ;;  %v2499_v33 = vpop.permute.xlu2 %2498 }
  0xe8   : > { %v2501_v57 = vunpack.i.h.bf16 %v2499_v33  ;;  %v2500_v28 = vunpack.i.l.bf16 %v2499_v33 }
  0xe9   : > { %v2449_v42 = vpop.permute.xlu1 %2448  ;;  %2668 = vrot.lane.b32.xlu0 %v3387_v4, %s3092_s9 }
  0xea   : > { %v3668_v0 = vsel %vm1663_vm2, %v1646_v59, %v2501_v57  ;;  %v3671_v60 = vsel %vm1663_vm2, %v1645_v55, %v2500_v28  ;;  %v2396_v57 = vunpack.i.h.bf16 %v3594_v15  ;;  %v477_v15 = vld [vmem:[#allocation2 + $0x189] sm:$0xff] }
  0xeb   : > { %v3673_v52 = vpop.permute.xlu0 %2458 }
  0xed   : > { %2678 = vrot.lane.b32.xlu2 %v3391_v5, %s3092_s9  ;;  %v1651_v5 = vsel %vm197_vm0, %v3535_v3, %v2435_v8  ;;  %v1635_v3 = vsel %vm197_vm0, %v3472_v16, %v2395_v9  ;;  %v2400_v9 = vunpack.i.l.bf16 %v3611_v6 }
  0xef   : > { %2673 = vrot.lane.b32.xlu1 %v3385_v1, %s3092_s9  ;;  %v2514_v4 = vpop.permute.xlu2 %2513 }
  0xf0   : > { %v2516_v62 = vunpack.i.h.bf16 %v2514_v4  ;;  %v2515_v33 = vunpack.i.l.bf16 %v2514_v4  ;;  %v476_v4 = vld [vmem:[#allocation2 + $0x181] sm:$0xff] }
  0xf1   : > { %v2464_v28 = vpop.permute.xlu1 %2463  ;;  %2683 = vrot.lane.b32.xlu0 %v3399_v13, %s3092_s9  ;;  %v3705_v44 = vpack.i.bf16 %v477_v15, %v476_v4 }
  0xf2   : > { %v2466_v39 = vunpack.i.h.bf16 %v2464_v28  ;;  %v2465_v59 = vunpack.i.l.bf16 %v2464_v28  ;;  %v3690_v1 = vsel %vm1663_vm2, %v1652_v21, %v2516_v62  ;;  %v3693_v55 = vsel %vm1663_vm2, %v1651_v5, %v2515_v33 }
  0xf3   : > { %v2474_v7 = vpop.permute.xlu0 %2473  ;;  %v1636_v33 = vsel %vm197_vm0, %v3474_v17, %v2396_v57  ;;  %v2451_v21 = vunpack.i.h.bf16 %v2449_v42  ;;  %v2450_v5 = vunpack.i.l.bf16 %v2449_v42 }
  0xf4   : > { %v1665_v13 = vsel %vm1663_vm2, %v1632_v53, %v2466_v39  ;;  %v1664_v8 = vsel %vm1663_vm2, %v1631_v11, %v2465_v59  ;;  %v2476_v28 = vunpack.i.h.bf16 %v2474_v7  ;;  %v2475_v62 = vunpack.i.l.bf16 %v2474_v7 }
  0xf5   : > { %2693 = vrot.lane.b32.xlu2 %v3403_v14, %s3092_s9  ;;  %v2401_v53 = vunpack.i.h.bf16 %v3611_v6  ;;  %v1658_v14 = vsel %vm197_vm0, %v3565_v32, %v2451_v21  ;;  %v1657_v43 = vsel %vm197_vm0, %v3563_v63, %v2450_v5  ;;  %v1637_v32 = vsel %vm197_vm0, %v3489_v29, %v2400_v9 }
  0xf6   : > { %v3708_v41 = vsel %vm1663_vm2, %v1636_v33, %v2476_v28  ;;  %v3711_v16 = vsel %vm1663_vm2, %v1635_v3, %v2475_v62  ;;  %v2416_v29 = vunpack.i.h.bf16 %v3621_v49  ;;  %v2415_v62 = vunpack.i.l.bf16 %v3621_v49 }
  0xf7   : > { %2688 = vrot.lane.b32.xlu1 %v3397_v10, %s3092_s9  ;;  %v2529_v17 = vpop.permute.xlu2 %2528  ;;  %v1638_v4 = vsel %vm197_vm0, %v3491_v30, %v2401_v53 }
  0xf8   : > { %v2531_v42 = vunpack.i.h.bf16 %v2529_v17  ;;  %v2530_v37 = vunpack.i.l.bf16 %v2529_v17  ;;  %v1644_v49 = vsel %vm197_vm0, %v3513_v51, %v2416_v29  ;;  %v4635_v29 = vld [vmem:[#allocation6_spill] sm:$0xff] }
  0xf9   : > { %v2479_v57 = vpop.permute.xlu1 %2478  ;;  %2698 = vrot.lane.b32.xlu0 %v3705_v44, %s3092_s9  ;;  %s4424_s9 = scalar_lea.vmem [#allocation3], %s2289_s8 }
  0xfa   : > { %v2481_v39 = vunpack.i.h.bf16 %v2479_v57  ;;  %v2480_v59 = vunpack.i.l.bf16 %v2479_v57  ;;  %v3724_v6 = vsel %vm1663_vm2, %v1658_v14, %v2531_v42  ;;  %v3727_v10 = vsel %vm1663_vm2, %v1657_v43, %v2530_v37 }
  0xfb   : > { %v2489_v15 = vpop.permute.xlu0 %2488 }
  0xfc   : > { %v1670_v63 = vsel %vm1663_vm2, %v1637_v32, %v2480_v59  ;;  %v1671_v11 = vsel %vm1663_vm2, %v1638_v4, %v2481_v39  ;;  %v2491_v3 = vunpack.i.h.bf16 %v2489_v15  ;;  %v2490_v7 = vunpack.i.l.bf16 %v2489_v15 }
  0xfd   : > { %2708 = vrot.lane.b32.xlu2 %v3413_v25, %s3093_s10 }
  0xfe   : > { %v3739_v28 = vsel %vm1663_vm2, %v3552_v45, %v2491_v3  ;;  %v3743_v30 = vsel %vm1663_vm2, %v3555_v48, %v2490_v7 }
  0xff   : > { %2703 = vrot.lane.b32.xlu1 %v3409_v20, %s3093_s10  ;;  %v2544_v33 = vpop.permute.xlu2 %2543  ;;  %v1643_v20 = vsel %vm197_vm0, %v3511_v50, %v2415_v62  ;;  %v2431_v50 = vunpack.i.h.bf16 %v3639_v23 }
 0x100   : > { %v2546_v21 = vunpack.i.h.bf16 %v2544_v33  ;;  %v2545_v5 = vunpack.i.l.bf16 %v2544_v33 }
 0x101   : > { %v2494_v25 = vpop.permute.xlu1 %2493  ;;  %2713 = vrot.lane.b32.xlu0 %v3420_v35, %s3093_s10 }
 0x102   : > { %v2496_v45 = vunpack.i.h.bf16 %v2494_v25  ;;  %v2495_v53 = vunpack.i.l.bf16 %v2494_v25  ;;  %v3752_v48 = vsel %vm1696_vm3, %v1665_v13, %v2546_v21  ;;  %v3755_v9 = vsel %vm1696_vm3, %v1664_v8, %v2545_v5 }
 0x103   : > { %v2504_v17 = vpop.permute.xlu0 %2503  ;;  %v2430_v8 = vunpack.i.l.bf16 %v3639_v23  ;;  %v1650_v23 = vsel %vm197_vm0, %v3543_v26, %v2431_v50 }
 0x104   : > { %v1676_v42 = vsel %vm1663_vm2, %v1643_v20, %v2495_v53  ;;  %v1677_v37 = vsel %vm1663_vm2, %v1644_v49, %v2496_v45  ;;  %v2506_v35 = vunpack.i.h.bf16 %v2504_v17  ;;  %v2505_v14 = vunpack.i.l.bf16 %v2504_v17  ;;  %v4637_v53 = vld [vmem:[#allocation24_spill] sm:$0xff]  ;;  %v4638_v49 = vld [vmem:[#allocation23_spill] sm:$0xff] }
 0x105   : > { %2723 = vrot.lane.b32.xlu2 %v3424_v36, %s3093_s10 }
 0x106   : > { %v3767_v13 = vsel %vm1663_vm2, %v3579_v22, %v2506_v35  ;;  %v3771_v51 = vsel %vm1663_vm2, %v3582_v19, %v2505_v14 }
 0x107   : > { %2718 = vrot.lane.b32.xlu1 %v3418_v31, %s3093_s10  ;;  %v2559_v43 = vpop.permute.xlu2 %2558  ;;  %v1649_v31 = vsel %vm197_vm0, %v3541_v24, %v2430_v8  ;;  %v2446_v24 = vunpack.i.h.bf16 %v3655_v56 }
 0x108   : > { %v2561_v57 = vunpack.i.h.bf16 %v2559_v43  ;;  %v2560_v39 = vunpack.i.l.bf16 %v2559_v43  ;;  %v4639_v43 = vld [vmem:[#allocation9_spill] sm:$0xff] }
 0x109   : > { %v2509_v59 = vpop.permute.xlu1 %2508  ;;  %2728 = vrot.lane.b32.xlu0 %v3432_v46, %s3093_s10 }
 0x10a   : > { %v2511_v36 = vunpack.i.h.bf16 %v2509_v59  ;;  %v2510_v22 = vunpack.i.l.bf16 %v2509_v59  ;;  %v3780_v4 = vsel %vm1696_vm3, %v1671_v11, %v2561_v57  ;;  %v3783_v19 = vsel %vm1696_vm3, %v1670_v63, %v2560_v39  ;;  %v4640_v59 = vld [vmem:[#allocation7_spill] sm:$0xff] }
 0x10b   : > { %v2519_v32 = vpop.permute.xlu0 %2518  ;;  %v2445_v11 = vunpack.i.l.bf16 %v3655_v56  ;;  %v1656_v56 = vsel %vm197_vm0, %v4637_v53, %v2446_v24  ;;  %v2461_v57 = vunpack.i.h.bf16 %v3673_v52  ;;  %v2460_v39 = vunpack.i.l.bf16 %v3673_v52  ;;  %v509_v53 = vld [vmem:[#allocation2 + $0x18a] sm:$0xff] }
 0x10c   : > { %v1682_v15 = vsel %vm1663_vm2, %v1649_v31, %v2510_v22  ;;  %v1683_v3 = vsel %vm1663_vm2, %v1650_v23, %v2511_v36  ;;  %v2521_v46 = vunpack.i.h.bf16 %v2519_v32  ;;  %v2520_v7 = vunpack.i.l.bf16 %v2519_v32  ;;  %v4641_v32 = vld [vmem:[#allocation11_spill] sm:$0xff] }
 0x10d   : > { %2738 = vrot.lane.b32.xlu2 %v3436_v47, %s3093_s10  ;;  %v4636_v47 = vld [vmem:[#allocation8_spill] sm:$0xff]  ;;  %v1655_v20 = vsel %vm197_vm0, %v4638_v49, %v2445_v11  ;;  %v1662_v52 = vsel %vm197_vm0, %v3592_v61, %v2461_v57  ;;  %v1661_v24 = vsel %vm197_vm0, %v3590_v34, %v2460_v39  ;;  %v4643_v34 = vld [vmem:[#allocation10_spill] sm:$0xff]  ;;  %v4644_v49 = vld [vmem:[#allocation13_spill] sm:$0xff] }
 0x10e   : > { %v3795_v63 = vsel %vm1663_vm2, %v3599_v27, %v2521_v46  ;;  %v3799_v26 = vsel %vm1663_vm2, %v3602_v40, %v2520_v7 }
 0x10f   : > { %2733 = vrot.lane.b32.xlu1 %v4635_v29, %s3093_s10  ;;  %v2574_v62 = vpop.permute.xlu2 %2573 }
 0x110   : > { %v2576_v33 = vunpack.i.h.bf16 %v2574_v62  ;;  %v2575_v21 = vunpack.i.l.bf16 %v2574_v62 }
 0x111   : > { %v2524_v5 = vpop.permute.xlu1 %2523  ;;  %2743 = vrot.lane.b32.xlu0 %v4636_v47, %s3093_s10 }
 0x112   : > { %v2526_v27 = vunpack.i.h.bf16 %v2524_v5  ;;  %v2525_v25 = vunpack.i.l.bf16 %v2524_v5  ;;  %v3808_v45 = vsel %vm1696_vm3, %v1676_v42, %v2575_v21  ;;  %v3811_v40 = vsel %vm1696_vm3, %v1677_v37, %v2576_v33  ;;  %v4642_v5 = vld [vmem:[#allocation12_spill] sm:$0xff] }
 0x113   : > { %v2534_v17 = vpop.permute.xlu0 %2533 }
 0x114   : > { %v1688_v35 = vsel %vm1663_vm2, %v1655_v20, %v2525_v25  ;;  %v1689_v14 = vsel %vm1663_vm2, %v1656_v56, %v2526_v27  ;;  %v2536_v50 = vunpack.i.h.bf16 %v2534_v17  ;;  %v2535_v8 = vunpack.i.l.bf16 %v2534_v17  ;;  %v508_v25 = vld [vmem:[#allocation2 + $0x182] sm:$0xff] }
 0x115   : > { %2753 = vrot.lane.b32.xlu2 %v4639_v43, %s3093_s10 }
 0x116   : > { %v3823_v42 = vsel %vm1663_vm2, %v3616_v58, %v2536_v50  ;;  %v3827_v37 = vsel %vm1663_vm2, %v3619_v54, %v2535_v8  ;;  %v3867_v8 = vpack.i.bf16 %v509_v53, %v508_v25 }
 0x117   : > { %2748 = vrot.lane.b32.xlu1 %v4640_v59, %s3093_s10  ;;  %v2589_v36 = vpop.permute.xlu2 %2588 }
 0x118   : > { %v2591_v22 = vunpack.i.h.bf16 %v2589_v36  ;;  %v2590_v23 = vunpack.i.l.bf16 %v2589_v36  ;;  %v4645_v36 = vld [vmem:[#allocation14_spill] sm:$0xff] }
 0x119   : > { %v2539_v31 = vpop.permute.xlu1 %2538  ;;  %2758 = vrot.lane.b32.xlu0 %v4641_v32, %s3093_s10 }
 0x11a   : > { %v2541_v58 = vunpack.i.h.bf16 %v2539_v31  ;;  %v2540_v46 = vunpack.i.l.bf16 %v2539_v31  ;;  %v3836_v7 = vsel %vm1696_vm3, %v1682_v15, %v2590_v23  ;;  %v3839_v54 = vsel %vm1696_vm3, %v1683_v3, %v2591_v22  ;;  %v4646_v31 = vld [vmem:[#allocation16_spill] sm:$0xff] }
 0x11b   : > { %v2549_v11 = vpop.permute.xlu0 %2548 }
 0x11c   : > { %v1694_v29 = vsel %vm1663_vm2, %v1661_v24, %v2540_v46  ;;  %v1695_v62 = vsel %vm1663_vm2, %v1662_v52, %v2541_v58  ;;  %v2551_v33 = vunpack.i.h.bf16 %v2549_v11  ;;  %v2550_v21 = vunpack.i.l.bf16 %v2549_v11 }
 0x11d   : > { %2768 = vrot.lane.b32.xlu2 %v4642_v5, %s3093_s10 }
 0x11e   : > { %v3851_v15 = vsel %vm1696_vm3, %v3634_v12, %v2550_v21  ;;  %v3855_v61 = vsel %vm1696_vm3, %v3637_v38, %v2551_v33  ;;  %v4647_v21 = vld [vmem:[#allocation17_spill] sm:$0xff] }
 0x11f   : > { %2763 = vrot.lane.b32.xlu1 %v4643_v34, %s3093_s10  ;;  %v2604_v3 = vpop.permute.xlu2 %2603 }
 0x120   : > { %v2606_v47 = vunpack.i.h.bf16 %v2604_v3  ;;  %v2605_v27 = vunpack.i.l.bf16 %v2604_v3 }
 0x121   : > { %v2554_v56 = vpop.permute.xlu1 %2553  ;;  %2773 = vrot.lane.b32.xlu0 %v4644_v49, %s3093_s10 }
 0x122   : > { %v2556_v20 = vunpack.i.h.bf16 %v2554_v56  ;;  %v2555_v17 = vunpack.i.l.bf16 %v2554_v56  ;;  %v3862_v12 = vsel %vm1696_vm3, %v1688_v35, %v2605_v27  ;;  %v3865_v38 = vsel %vm1696_vm3, %v1689_v14, %v2606_v47  ;;  %v4649_v47 = vld [vmem:[#allocation19_spill] sm:$0xff] }
 0x123   : > { %v2564_v50 = vpop.permute.xlu0 %2563 }
 0x124   : > { %v1701_v43 = vsel %vm1696_vm3, %v3711_v16, %v2555_v17  ;;  %v1702_v57 = vsel %vm1696_vm3, %v3708_v41, %v2556_v20  ;;  %v2566_v39 = vunpack.i.h.bf16 %v2564_v50  ;;  %v2565_v59 = vunpack.i.l.bf16 %v2564_v50  ;;  %v4650_v50 = vld [vmem:[#allocation20_spill] sm:$0xff] }
 0x125   : > { %2783 = vrot.lane.b32.xlu2 %v4645_v36, %s3094_s11 }
 0x126   : > { %v3877_v35 = vsel %vm1696_vm3, %v3649_v18, %v2566_v39  ;;  %v3881_v14 = vsel %vm1696_vm3, %v3653_v2, %v2565_v59 }
 0x127   : > { %2778 = vrot.lane.b32.xlu1 %v3867_v8, %s3093_s10  ;;  %v2619_v16 = vpop.permute.xlu2 %2618  ;;  %s2324_s10 = sshll.u32 %s3146_s19, 8  ;;  %s2220_s19 = sshll.u32 %s4424_s9, 4  ;;  %s2221_s19 = int_to_ptr.vmem [resolvable:$true] %s2220_s19 }
 0x128   : > { %v2621_v22 = vunpack.i.h.bf16 %v2619_v16  ;;  %v2620_v41 = vunpack.i.l.bf16 %v2619_v16  ;;  %v4652_v16 = vld [vmem:[#allocation22_spill] sm:$0xff] }
 0x129   : > { %v2569_v23 = vpop.permute.xlu1 %2568  ;;  %2788 = vrot.lane.b32.xlu0 %v4646_v31, %s3094_s11  ;;  %v560_v31 = vld [vmem:[#allocation2 + $0xf9] sm:$0xff] }
 0x12a   : > { %v2571_v32 = vunpack.i.h.bf16 %v2569_v23  ;;  %v2570_v58 = vunpack.i.l.bf16 %v2569_v23  ;;  %v3888_v46 = vsel %vm1696_vm3, %v1694_v29, %v2620_v41  ;;  %v3891_v18 = vsel %vm1696_vm3, %v1695_v62, %v2621_v22  ;;  %v4648_v62 = vld [vmem:[#allocation15_spill] sm:$0xff] }
 0x12b   : > { %v2579_v2 = vpop.permute.xlu0 %2578 }
 0x12c   : > { %v1707_v52 = vsel %vm1696_vm3, %v3743_v30, %v2570_v58  ;;  %v1708_v24 = vsel %vm1696_vm3, %v3739_v28, %v2571_v32  ;;  %v2581_v11 = vunpack.i.h.bf16 %v2579_v2  ;;  %v2580_v33 = vunpack.i.l.bf16 %v2579_v2 }
 0x12d   : > { %2798 = vrot.lane.b32.xlu2 %v4647_v21, %s3094_s11  ;;  %v4653_v21 = vld [vmem:[#allocation25_spill] sm:$0xff] }
 0x12e   : > { %v3901_v5 = vsel %vm1696_vm3, %v3668_v0, %v2581_v11  ;;  %v3905_v29 = vsel %vm1696_vm3, %v3671_v60, %v2580_v33 }
 0x12f   : > { %2793 = vrot.lane.b32.xlu1 %v4648_v62, %s3094_s11  ;;  %v2634_v30 = vpop.permute.xlu2 %2633 }
 0x130   : > { %v2636_v34 = vunpack.i.h.bf16 %v2634_v30  ;;  %v2635_v28 = vunpack.i.l.bf16 %v2634_v30  ;;  %v591_v30 = vld [vmem:[#allocation2 + $0xf2] sm:$0xff] }
 0x131   : > { %v2584_v3 = vpop.permute.xlu1 %2583  ;;  %2803 = vrot.lane.b32.xlu0 %v4649_v47, %s3094_s11  ;;  %v567_v47 = vld [vmem:[#allocation2 + $0x151] sm:$0xff] }
 0x132   : > { %v2586_v27 = vunpack.i.h.bf16 %v2584_v3  ;;  %v2585_v25 = vunpack.i.l.bf16 %v2584_v3  ;;  %v3912_v0 = vsel %vm1729_vm4, %v1701_v43, %v2635_v28  ;;  %v3915_v53 = vsel %vm1729_vm4, %v1702_v57, %v2636_v34  ;;  %v4651_v57 = vld [vmem:[#allocation18_spill] sm:$0xff]  ;;  %v592_v34 = vld [vmem:[#allocation2 + $0xfa] sm:$0xff] }
 0x133   : > { %v2594_v60 = vpop.permute.xlu0 %2593 }
 0x134   : > { %v1713_v56 = vsel %vm1696_vm3, %v3771_v51, %v2585_v25  ;;  %v1714_v49 = vsel %vm1696_vm3, %v3767_v13, %v2586_v27  ;;  %v2596_v20 = vunpack.i.h.bf16 %v2594_v60  ;;  %v2595_v17 = vunpack.i.l.bf16 %v2594_v60  ;;  %v568_v27 = vld [vmem:[#allocation2 + $0x159] sm:$0xff] }
 0x135   : > { %2813 = vrot.lane.b32.xlu2 %v4650_v50, %s3094_s11  ;;  %v599_v50 = vld [vmem:[#allocation2 + $0x152] sm:$0xff] }
 0x136   : > { %v3925_v39 = vsel %vm1696_vm3, %v3690_v1, %v2596_v20  ;;  %v3929_v43 = vsel %vm1696_vm3, %v3693_v55, %v2595_v17  ;;  %v559_v55 = vld [vmem:[#allocation2 + $0xf1] sm:$0xff] }
 0x137   : > { %2808 = vrot.lane.b32.xlu1 %v4651_v57, %s3094_s11  ;;  %v2649_v51 = vpop.permute.xlu2 %2648  ;;  %v2832_v62 = vpack.i.bf16 %v560_v31, %v559_v55  ;;  %v600_v57 = vld [vmem:[#allocation2 + $0x15a] sm:$0xff]  ;;  %v551_v55 = vld [vmem:[#allocation2 + $0x91] sm:$0xff] }
 0x138   : > { %v2651_v59 = vunpack.i.h.bf16 %v2649_v51  ;;  %v2650_v36 = vunpack.i.l.bf16 %v2649_v51  ;;  %v552_v31 = vld [vmem:[#allocation2 + $0x99] sm:$0xff] }
 0x139   : > { %v2599_v13 = vpop.permute.xlu1 %2598  ;;  %2818 = vrot.lane.b32.xlu0 %v4652_v16, %s3094_s11 }
 0x13a   : > { %v2601_v22 = vunpack.i.h.bf16 %v2599_v13  ;;  %v2600_v41 = vunpack.i.l.bf16 %v2599_v13  ;;  %v3936_v23 = vsel %vm1729_vm4, %v1707_v52, %v2650_v36  ;;  %v3939_v1 = vsel %vm1729_vm4, %v1708_v24, %v2651_v59 }
 0x13b   : > { %v2609_v32 = vpop.permute.xlu0 %2608  ;;  %v2837_v59 = vpack.i.bf16 %v568_v27, %v567_v47 }
 0x13c   : > { %v1719_v58 = vsel %vm1696_vm3, %v3799_v26, %v2600_v41  ;;  %v1720_v2 = vsel %vm1696_vm3, %v3795_v63, %v2601_v22  ;;  %v2611_v11 = vunpack.i.h.bf16 %v2609_v32  ;;  %v2610_v33 = vunpack.i.l.bf16 %v2609_v32  ;;  %v4654_v26 = vld [vmem:[#allocation21_spill] sm:$0xff] }
 0x13d   : > { %2828 = vrot.lane.b32.xlu2 %v4653_v21, %s3094_s11 }
 0x13e   : > { %v3949_v52 = vsel %vm1696_vm3, %v3724_v6, %v2611_v11  ;;  %v3953_v24 = vsel %vm1696_vm3, %v3727_v10, %v2610_v33  ;;  %v2842_v6 = vpack.i.bf16 %v592_v34, %v591_v30  ;;  %v543_v11 = vld [vmem:[#allocation2 + $0x31] sm:$0xff]  ;;  %v544_v33 = vld [vmem:[#allocation2 + $0x39] sm:$0xff] }
 0x13f   : > { %2823 = vrot.lane.b32.xlu1 %v4654_v26, %s3094_s11  ;;  %v2664_v63 = vpop.permute.xlu2 %2663  ;;  %v575_v26 = vld [vmem:[#allocation2 + $0x32] sm:$0xff] }
 0x140   : > { %v2666_v28 = vunpack.i.h.bf16 %v2664_v63  ;;  %v2665_v3 = vunpack.i.l.bf16 %v2664_v63  ;;  %v576_v63 = vld [vmem:[#allocation2 + $0x3a] sm:$0xff] }
 0x141   : > { %v2614_v25 = vpop.permute.xlu1 %2613  ;;  %2833 = vrot.lane.b32.xlu0 %v2832_v62, %s3095_s12  ;;  %v2857_v62 = vpack.i.bf16 %v552_v31, %v551_v55 }
 0x142   : > { %v2616_v60 = vunpack.i.h.bf16 %v2614_v25  ;;  %v2615_v20 = vunpack.i.l.bf16 %v2614_v25  ;;  %v3959_v10 = vsel %vm1729_vm4, %v1713_v56, %v2665_v3  ;;  %v3962_v17 = vsel %vm1729_vm4, %v1714_v49, %v2666_v28 }
 0x143   : > { %v2624_v51 = vpop.permute.xlu0 %2623  ;;  %v2847_v56 = vpack.i.bf16 %v600_v57, %v599_v50  ;;  %v2852_v3 = vpack.i.bf16 %v544_v33, %v543_v11  ;;  %v530_v50 = vld [vmem:[#allocation2 + $0x110] sm:$0xff] }
 0x144   : > { %v1725_v36 = vsel %vm1696_vm3, %v3827_v37, %v2615_v20  ;;  %v1726_v13 = vsel %vm1696_vm3, %v3823_v42, %v2616_v60  ;;  %v2626_v16 = vunpack.i.h.bf16 %v2624_v51  ;;  %v2625_v22 = vunpack.i.l.bf16 %v2624_v51  ;;  %v529_v20 = vld [vmem:[#allocation2 + $0x108] sm:$0xff]  ;;  %v583_v51 = vld [vmem:[#allocation2 + $0x92] sm:$0xff] }
 0x145   : > { %2843 = vrot.lane.b32.xlu2 %v2842_v6, %s3096_s13  ;;  %v2862_v60 = vpack.i.bf16 %v576_v63, %v575_v26  ;;  %v562_v26 = vld [vmem:[#allocation2 + $0x111] sm:$0xff] }
 0x146   : > { %v3971_v49 = vsel %vm1729_vm4, %v3752_v48, %v2626_v16  ;;  %v3975_v41 = vsel %vm1729_vm4, %v3755_v9, %v2625_v22  ;;  %v2872_v22 = vpack.i.bf16 %v530_v50, %v529_v20  ;;  %v594_v20 = vld [vmem:[#allocation2 + $0x112] sm:$0xff] }
 0x147   : > { %2838 = vrot.lane.b32.xlu1 %v2837_v59, %s3095_s12  ;;  %v2679_v37 = vpop.permute.xlu2 %2678  ;;  %v584_v59 = vld [vmem:[#allocation2 + $0x9a] sm:$0xff] }
 0x148   : > { %v2681_v42 = vunpack.i.h.bf16 %v2679_v37  ;;  %v2680_v32 = vunpack.i.l.bf16 %v2679_v37  ;;  %v2867_v37 = vpack.i.bf16 %v584_v59, %v583_v51 }
 0x149   : > { %v2629_v21 = vpop.permute.xlu1 %2628  ;;  %2848 = vrot.lane.b32.xlu0 %v2847_v56, %s3096_s13 }
 0x14a   : > { %v2631_v30 = vunpack.i.h.bf16 %v2629_v21  ;;  %v2630_v48 = vunpack.i.l.bf16 %v2629_v21  ;;  %v3980_v34 = vsel %vm1729_vm4, %v1719_v58, %v2680_v32  ;;  %v3983_v9 = vsel %vm1729_vm4, %v1720_v2, %v2681_v42 }
 0x14b   : > { %v2639_v28 = vpop.permute.xlu0 %2638 }
 0x14c   : > { %v1732_v47 = vsel %vm1729_vm4, %v3851_v15, %v2630_v48  ;;  %v1733_v27 = vsel %vm1729_vm4, %v3855_v61, %v2631_v30  ;;  %v2641_v25 = vunpack.i.h.bf16 %v2639_v28  ;;  %v2640_v6 = vunpack.i.l.bf16 %v2639_v28  ;;  %v561_v48 = vld [vmem:[#allocation2 + $0x109] sm:$0xff] }
 0x14d   : > { %2858 = vrot.lane.b32.xlu2 %v2857_v62, %s3095_s12  ;;  %v570_v62 = vld [vmem:[#allocation2 + $0x171] sm:$0xff] }
 0x14e   : > { %v3992_v58 = vsel %vm1729_vm4, %v3780_v4, %v2641_v25  ;;  %v3996_v2 = vsel %vm1729_vm4, %v3783_v19, %v2640_v6  ;;  %v4655_v28 = vld [vmem:[#allocation26_spill] sm:$0xff] }
 0x14f   : > { %2853 = vrot.lane.b32.xlu1 %v2852_v3, %s3095_s12  ;;  %v2694_v15 = vpop.permute.xlu2 %2693 }
 0x150   : > { %v2696_v57 = vunpack.i.h.bf16 %v2694_v15  ;;  %v2695_v61 = vunpack.i.l.bf16 %v2694_v15  ;;  %v2882_v15 = vpack.i.bf16 %v562_v26, %v561_v48 }
 0x151   : > { %v2644_v16 = vpop.permute.xlu1 %2643  ;;  %2863 = vrot.lane.b32.xlu0 %v2862_v60, %s3096_s13  ;;  %v593_v60 = vld [vmem:[#allocation2 + $0x10a] sm:$0xff] }
 0x152   : > { %v2646_v56 = vunpack.i.h.bf16 %v2644_v16  ;;  %v2645_v4 = vunpack.i.l.bf16 %v2644_v16  ;;  %v4001_v55 = vsel %vm1729_vm4, %v1725_v36, %v2695_v61  ;;  %v4004_v19 = vsel %vm1729_vm4, %v1726_v13, %v2696_v57  ;;  %v569_v13 = vld [vmem:[#allocation2 + $0x169] sm:$0xff] }
 0x153   : > { %v2654_v31 = vpop.permute.xlu0 %2653  ;;  %v2892_v16 = vpack.i.bf16 %v594_v20, %v593_v60  ;;  %v586_v60 = vld [vmem:[#allocation2 + $0xb2] sm:$0xff] }
 0x154   : > { %v1738_v42 = vsel %vm1729_vm4, %v3881_v14, %v2645_v4  ;;  %v1739_v32 = vsel %vm1729_vm4, %v3877_v35, %v2646_v56  ;;  %v2656_v11 = vunpack.i.h.bf16 %v2654_v31  ;;  %v2655_v33 = vunpack.i.l.bf16 %v2654_v31  ;;  %v546_v56 = vld [vmem:[#allocation2 + $0x51] sm:$0xff] }
 0x155   : > { %2873 = vrot.lane.b32.xlu2 %v2872_v22, %s3094_s11  ;;  %v545_v22 = vld [vmem:[#allocation2 + $0x49] sm:$0xff] }
 0x156   : > { %v4013_v21 = vsel %vm1729_vm4, %v3808_v45, %v2655_v33  ;;  %v4017_v36 = vsel %vm1729_vm4, %v3811_v40, %v2656_v11  ;;  %v2887_v45 = vpack.i.bf16 %v570_v62, %v569_v13  ;;  %v601_v31 = vld [vmem:[#allocation2 + $0x16a] sm:$0xff]  ;;  %v2902_v33 = vpack.i.bf16 %v546_v56, %v545_v22  ;;  %v531_v56 = vld [vmem:[#allocation2 + $0x120] sm:$0xff] }
 0x157   : > { %2868 = vrot.lane.b32.xlu1 %v2867_v37, %s3096_s13  ;;  %v2709_v14 = vpop.permute.xlu2 %2708  ;;  %v602_v37 = vld [vmem:[#allocation2 + $0x172] sm:$0xff] }
 0x158   : > { %v2711_v30 = vunpack.i.h.bf16 %v2709_v14  ;;  %v2710_v35 = vunpack.i.l.bf16 %v2709_v14  ;;  %v553_v14 = vld [vmem:[#allocation2 + $0xa9] sm:$0xff]  ;;  %v2897_v48 = vpack.i.bf16 %v602_v37, %v601_v31 }
 0x159   : > { %v2659_v63 = vpop.permute.xlu1 %2658  ;;  %2878 = vrot.lane.b32.xlu0 %v4655_v28, %s3094_s11 }
 0x15a   : > { %v2661_v3 = vunpack.i.h.bf16 %v2659_v63  ;;  %v2660_v25 = vunpack.i.l.bf16 %v2659_v63  ;;  %v4023_v40 = vsel %vm1762_vm5, %v1732_v47, %v2710_v35  ;;  %v4026_v6 = vsel %vm1762_vm5, %v1733_v27, %v2711_v30  ;;  %v554_v30 = vld [vmem:[#allocation2 + $0xb1] sm:$0xff] }
 0x15b   : > { %v2669_v50 = vpop.permute.xlu0 %2668 }
 0x15c   : > { %v1744_v57 = vsel %vm1729_vm4, %v3905_v29, %v2660_v25  ;;  %v1745_v61 = vsel %vm1729_vm4, %v3901_v5, %v2661_v3  ;;  %v2671_v51 = vunpack.i.h.bf16 %v2669_v50  ;;  %v2670_v59 = vunpack.i.l.bf16 %v2669_v50  ;;  %v585_v25 = vld [vmem:[#allocation2 + $0xaa] sm:$0xff] }
 0x15d   : > { %2888 = vrot.lane.b32.xlu2 %v2887_v45, %s3095_s12  ;;  %v2907_v3 = vpack.i.bf16 %v554_v30, %v553_v14  ;;  %v577_v50 = vld [vmem:[#allocation2 + $0x4a] sm:$0xff] }
 0x15e   : > { %v4035_v47 = vsel %vm1729_vm4, %v3836_v7, %v2670_v59  ;;  %v4039_v27 = vsel %vm1729_vm4, %v3839_v54, %v2671_v51  ;;  %v2917_v59 = vpack.i.bf16 %v586_v60, %v585_v25  ;;  %v564_v14 = vld [vmem:[#allocation2 + $0x129] sm:$0xff] }
 0x15f   : > { %2883 = vrot.lane.b32.xlu1 %v2882_v15, %s3095_s12  ;;  %v2724_v29 = vpop.permute.xlu2 %2723  ;;  %v578_v15 = vld [vmem:[#allocation2 + $0x52] sm:$0xff] }
 0x160   : > { %v2726_v4 = vunpack.i.h.bf16 %v2724_v29  ;;  %v2725_v5 = vunpack.i.l.bf16 %v2724_v29  ;;  %v532_v29 = vld [vmem:[#allocation2 + $0x128] sm:$0xff] }
 0x161   : > { %v2674_v11 = vpop.permute.xlu1 %2673  ;;  %2893 = vrot.lane.b32.xlu0 %v2892_v16, %s3096_s13 }
 0x162   : > { %v2676_v13 = vunpack.i.h.bf16 %v2674_v11  ;;  %v2675_v7 = vunpack.i.l.bf16 %v2674_v11  ;;  %v4044_v62 = vsel %vm1762_vm5, %v1738_v42, %v2725_v5  ;;  %v4047_v54 = vsel %vm1762_vm5, %v1739_v32, %v2726_v4 }
 0x163   : > { %v2684_v35 = vpop.permute.xlu0 %2683  ;;  %v2912_v5 = vpack.i.bf16 %v578_v15, %v577_v50 }
 0x164   : > { %v1750_v26 = vsel %vm1729_vm4, %v3929_v43, %v2675_v7  ;;  %v1751_v63 = vsel %vm1729_vm4, %v3925_v39, %v2676_v13  ;;  %v2686_v28 = vunpack.i.h.bf16 %v2684_v35  ;;  %v2685_v45 = vunpack.i.l.bf16 %v2684_v35  ;;  %v563_v7 = vld [vmem:[#allocation2 + $0x121] sm:$0xff] }
 0x165   : > { %2903 = vrot.lane.b32.xlu2 %v2902_v33, %s3095_s12  ;;  %v2922_v13 = vpack.i.bf16 %v532_v29, %v531_v56  ;;  %v539_v35 = vld [vmem:[#allocation2 + $0x180] sm:$0xff] }
 0x166   : > { %v4056_v42 = vsel %vm1729_vm4, %v3862_v12, %v2685_v45  ;;  %v4060_v32 = vsel %vm1729_vm4, %v3865_v38, %v2686_v28  ;;  %v2932_v45 = vpack.i.bf16 %v564_v14, %v563_v7 }
 0x167   : > { %2898 = vrot.lane.b32.xlu1 %v2897_v48, %s3096_s13  ;;  %v2739_v43 = vpop.permute.xlu2 %2738  ;;  %v540_v48 = vld [vmem:[#allocation2 + $0x188] sm:$0xff] }
 0x168   : > { %v2741_v20 = vunpack.i.h.bf16 %v2739_v43  ;;  %v2740_v39 = vunpack.i.l.bf16 %v2739_v43  ;;  %v2927_v43 = vpack.i.bf16 %v540_v48, %v539_v35  ;;  %v556_v35 = vld [vmem:[#allocation2 + $0xc9] sm:$0xff] }
 0x169   : > { %v2689_v51 = vpop.permute.xlu1 %2688  ;;  %2908 = vrot.lane.b32.xlu0 %v2907_v3, %s3095_s12 }
 0x16a   : > { %v2691_v16 = vunpack.i.h.bf16 %v2689_v51  ;;  %v2690_v12 = vunpack.i.l.bf16 %v2689_v51  ;;  %v4065_v22 = vsel %vm1762_vm5, %v1744_v57, %v2740_v39  ;;  %v4068_v38 = vsel %vm1762_vm5, %v1745_v61, %v2741_v20 }
 0x16b   : > { %v2699_v4 = vpop.permute.xlu0 %2698 }
 0x16c   : > { %v1756_v31 = vsel %vm1729_vm4, %v3953_v24, %v2690_v12  ;;  %v1757_v37 = vsel %vm1729_vm4, %v3949_v52, %v2691_v16  ;;  %v2701_v11 = vunpack.i.h.bf16 %v2699_v4  ;;  %v2700_v33 = vunpack.i.l.bf16 %v2699_v4  ;;  %v595_v16 = vld [vmem:[#allocation2 + $0x122] sm:$0xff] }
 0x16d   : > { %2918 = vrot.lane.b32.xlu2 %v2917_v59, %s3096_s13 }
 0x16e   : > { %v4077_v57 = vsel %vm1729_vm4, %v3888_v46, %v2700_v33  ;;  %v4081_v61 = vsel %vm1729_vm4, %v3891_v18, %v2701_v11 }
 0x16f   : > { %2913 = vrot.lane.b32.xlu1 %v2912_v5, %s3096_s13  ;;  %v2754_v24 = vpop.permute.xlu2 %2753  ;;  %v548_v5 = vld [vmem:[#allocation2 + $0x69] sm:$0xff] }
 0x170   : > { %v2756_v30 = vunpack.i.h.bf16 %v2754_v24  ;;  %v2755_v52 = vunpack.i.l.bf16 %v2754_v24 }
 0x171   : > { %v2704_v28 = vpop.permute.xlu1 %2703  ;;  %2923 = vrot.lane.b32.xlu0 %v2922_v13, %s3094_s11 }
 0x172   : > { %v2706_v3 = vunpack.i.h.bf16 %v2704_v28  ;;  %v2705_v46 = vunpack.i.l.bf16 %v2704_v28  ;;  %v4086_v25 = vsel %vm1762_vm5, %v1750_v26, %v2755_v52  ;;  %v4089_v18 = vsel %vm1762_vm5, %v1751_v63, %v2756_v30  ;;  %v579_v30 = vld [vmem:[#allocation2 + $0x62] sm:$0xff]  ;;  %v580_v52 = vld [vmem:[#allocation2 + $0x6a] sm:$0xff] }
 0x173   : > { %v2714_v60 = vpop.permute.xlu0 %2713 }
 0x174   : > { %v4093_v20 = vsel %vm1762_vm5, %v3975_v41, %v2705_v46  ;;  %v4097_v39 = vsel %vm1762_vm5, %v3971_v49, %v2706_v3  ;;  %v2716_v50 = vunpack.i.h.bf16 %v2714_v60  ;;  %v2715_v15 = vunpack.i.l.bf16 %v2714_v60  ;;  %v596_v49 = vld [vmem:[#allocation2 + $0x12a] sm:$0xff] }
 0x175   : > { %2933 = vrot.lane.b32.xlu2 %v2932_v45, %s3095_s12  ;;  %v2942_v33 = vpack.i.bf16 %v596_v49, %v595_v16  ;;  %v588_v3 = vld [vmem:[#allocation2 + $0xca] sm:$0xff]  ;;  %v533_v49 = vld [vmem:[#allocation2 + $0x138] sm:$0xff] }
 0x176   : > { %v4102_v26 = vsel %vm1762_vm5, %v3912_v0, %v2715_v15  ;;  %v4106_v63 = vsel %vm1762_vm5, %v3915_v53, %v2716_v50  ;;  %v547_v53 = vld [vmem:[#allocation2 + $0x61] sm:$0xff]  ;;  %v541_v15 = vld [vmem:[#allocation2 + $0x198] sm:$0xff] }
 0x177   : > { %2928 = vrot.lane.b32.xlu1 %v2927_v43, %s3094_s11  ;;  %v2769_v41 = vpop.permute.xlu2 %2768 }
 0x178   : > { %v2771_v51 = vunpack.i.h.bf16 %v2769_v41  ;;  %v2770_v59 = vunpack.i.l.bf16 %v2769_v41  ;;  %v542_v41 = vld [vmem:[#allocation2 + $0x1a0] sm:$0xff] }
 0x179   : > { %v2719_v12 = vpop.permute.xlu1 %2718  ;;  %2938 = vrot.lane.b32.xlu0 %v3705_v44, %s3095_s12 }
 0x17a   : > { %v2721_v56 = vunpack.i.h.bf16 %v2719_v12  ;;  %v2720_v29 = vunpack.i.l.bf16 %v2719_v12  ;;  %v4112_v0 = vsel %vm1762_vm5, %v1756_v31, %v2770_v59  ;;  %v4115_v4 = vsel %vm1762_vm5, %v1757_v37, %v2771_v51  ;;  %v534_v12 = vld [vmem:[#allocation2 + $0x140] sm:$0xff] }
 0x17b   : > { %v2729_v11 = vpop.permute.xlu0 %2728  ;;  %v2952_v31 = vpack.i.bf16 %v548_v5, %v547_v53 }
 0x17c   : > { %v1769_v13 = vsel %vm1762_vm5, %v3996_v2, %v2720_v29  ;;  %v1770_v7 = vsel %vm1762_vm5, %v3992_v58, %v2721_v56  ;;  %v2731_v14 = vunpack.i.h.bf16 %v2729_v11  ;;  %v2730_v44 = vunpack.i.l.bf16 %v2729_v11  ;;  %v555_v58 = vld [vmem:[#allocation2 + $0xc1] sm:$0xff]  ;;  %v565_v11 = vld [vmem:[#allocation2 + $0x139] sm:$0xff] }
 0x17d   : > { %2948 = vrot.lane.b32.xlu2 %v3867_v8, %s3096_s13  ;;  %v2962_v8 = vpack.i.bf16 %v580_v52, %v579_v30 }
 0x17e   : > { %v4125_v37 = vsel %vm1762_vm5, %v3936_v23, %v2730_v44  ;;  %v4129_v24 = vsel %vm1762_vm5, %v3939_v1, %v2731_v14  ;;  %v587_v23 = vld [vmem:[#allocation2 + $0xc2] sm:$0xff]  ;;  %v2957_v1 = vpack.i.bf16 %v556_v35, %v555_v58  ;;  %v2972_v44 = vpack.i.bf16 %v534_v12, %v533_v49  ;;  %v597_v35 = vld [vmem:[#allocation2 + $0x13a] sm:$0xff] }
 0x17f   : > { %2943 = vrot.lane.b32.xlu1 %v2942_v33, %s3096_s13  ;;  %v4132_v2 = vpop.permute.xlu2 %2783  ;;  %v2967_v50 = vpack.i.bf16 %v588_v3, %v587_v23  ;;  %v566_v33 = vld [vmem:[#allocation2 + $0x141] sm:$0xff] }
 0x180   : > { %v605_v12 = vld [vmem:[#allocation2 + $0x19a] sm:$0xff] }
 0x181   : > { %v2734_v48 = vpop.permute.xlu1 %2733  ;;  %2953 = vrot.lane.b32.xlu0 %v2952_v31, %s3095_s12 }
 0x182   : > { %v2736_v28 = vunpack.i.h.bf16 %v2734_v48  ;;  %v2735_v45 = vunpack.i.l.bf16 %v2734_v48 }
 0x183   : > { %v4135_v46 = vpop.permute.xlu0 %2743 }
 0x184   : > { %v1775_v60 = vsel %vm1762_vm5, %v4013_v21, %v2735_v45  ;;  %v1776_v43 = vsel %vm1762_vm5, %v4017_v36, %v2736_v28  ;;  %v2977_v21 = vpack.i.bf16 %v542_v41, %v541_v15 }
 0x185   : > { %2963 = vrot.lane.b32.xlu2 %v2962_v8, %s3096_s13 }
 0x187   : > { %2958 = vrot.lane.b32.xlu1 %v2957_v1, %s3095_s12  ;;  %v2799_v51 = vpop.permute.xlu2 %2798 }
 0x188   : > { %v2801_v59 = vunpack.i.h.bf16 %v2799_v51  ;;  %v2800_v16 = vunpack.i.l.bf16 %v2799_v51 }
 0x189   : > { %v2749_v56 = vpop.permute.xlu1 %2748  ;;  %2968 = vrot.lane.b32.xlu0 %v2967_v50, %s3096_s13  ;;  %v574_v50 = vld [vmem:[#allocation2 + $0x1a1] sm:$0xff] }
 0x18a   : > { %v2751_v29 = vunpack.i.h.bf16 %v2749_v56  ;;  %v2750_v53 = vunpack.i.l.bf16 %v2749_v56  ;;  %v4145_v36 = vsel %vm1795_vm6, %v1769_v13, %v2800_v16  ;;  %v4148_v5 = vsel %vm1795_vm6, %v1770_v7, %v2801_v59  ;;  %v598_v7 = vld [vmem:[#allocation2 + $0x142] sm:$0xff] }
 0x18b   : > { %v2759_v14 = vpop.permute.xlu0 %2758  ;;  %v2982_v13 = vpack.i.bf16 %v566_v33, %v565_v11  ;;  %v2992_v51 = vpack.i.bf16 %v598_v7, %v597_v35  ;;  %v606_v56 = vld [vmem:[#allocation2 + $0x1a2] sm:$0xff] }
 0x18c   : > { %v4152_v31 = vsel %vm1762_vm5, %v4035_v47, %v2750_v53  ;;  %v4156_v30 = vsel %vm1762_vm5, %v4039_v27, %v2751_v29  ;;  %v2761_v52 = vunpack.i.h.bf16 %v2759_v14  ;;  %v2760_v58 = vunpack.i.l.bf16 %v2759_v14  ;;  %v2298_v47 = vld [vmem:[%s4587_s1 + $0x8] sm:$0xf]  ;;  %v2323_v27 = vld [vmem:[%s4587_s1 + $0x8] sm:$0x30] }
 0x18d   : > { %2978 = vrot.lane.b32.xlu2 %v2977_v21, %s3094_s11  ;;  %v2299_v45 = vor.u32 %v2323_v27, %v2298_v47  ;;  %v2997_v33 = vpack.i.bf16 %v606_v56, %v605_v12  ;;  %v550_v35 = vld [vmem:[#allocation2 + $0x81] sm:$0xff] }
 0x18e   : > { %v4161_v48 = vsel %vm1762_vm5, %v3980_v34, %v2760_v58  ;;  %v4165_v8 = vsel %vm1762_vm5, %v3983_v9, %v2761_v52  ;;  %v3097_v34 = vmov 65535   ;;  %v573_v9 = vld [vmem:[#allocation2 + $0x199] sm:$0xff]  ;;  %v558_v52 = vld [vmem:[#allocation2 + $0xe1] sm:$0xff] }
 0x18f   : > { %2973 = vrot.lane.b32.xlu1 %v2972_v44, %s3094_s11  ;;  %v2814_v28 = vpop.permute.xlu2 %2813  ;;  %v1976_v23 = vsel %vm1974_vm7, 4294967295, %v3097_v34  ;;  %v2987_v29 = vpack.i.bf16 %v574_v50, %v573_v9  ;;  %v557_v44 = vld [vmem:[#allocation2 + $0xd9] sm:$0xff]  ;;  %v590_v12 = vld [vmem:[#allocation2 + $0xe2] sm:$0xff] }
 0x190   : > { %v2816_v3 = vunpack.i.h.bf16 %v2814_v28  ;;  %v2815_v1 = vunpack.i.l.bf16 %v2814_v28  ;;  %v1977_v15 = vsel %vm1975_vm8, %v1976_v23, 0  ;;  %v582_v28 = vld [vmem:[#allocation2 + $0x82] sm:$0xff] }
 0x191   : > { %v4174_v41 = vpop.permute.xlu1 %2763  ;;  %2983 = vrot.lane.b32.xlu0 %v2982_v13, %s3095_s12  ;;  %v1979_v59 = vand.u32 %v2299_v45, %v1977_v15  ;;  %v549_v13 = vld [vmem:[#allocation2 + $0x79] sm:$0xff] }
 0x192   : > { %v4178_v16 = vsel %vm1795_vm6, %v1775_v60, %v2815_v1  ;;  %v4181_v49 = vsel %vm1795_vm6, %v1776_v43, %v2816_v3  ;;  %v2322_v60 = vld [vmem:[%s4587_s1] sm:$0xff]  ;;  %v3002_v34 = vpack.i.bf16 %v550_v35, %v549_v13  ;;  %v2745_v13 = vunpack.i.l.bf16 %v4135_v46 }
 0x193   : > { %v2774_v21 = vpop.permute.xlu0 %2773  ;;  %2326 = vmatpush.bf16.msra.mxu2 %v1979_v59  ;;  %2327 = vmatpush.bf16.msra.mxu3 %v1979_v59 }
 0x194   : > { %v2776_v53 = vunpack.i.h.bf16 %v2774_v21  ;;  %v2775_v11 = vunpack.i.l.bf16 %v2774_v21  ;;  %1987 = vmatpush.bf16.msra.mxu0 %v1979_v59  ;;  %2325 = vmatpush.bf16.msra.mxu1 %v1979_v59  ;;  %v589_v59 = vld [vmem:[#allocation2 + $0xda] sm:$0xff] }
 0x195   : > { %2993 = vrot.lane.b32.xlu2 %v2992_v51, %s3096_s13 }
 0x196   : > { %v4189_v43 = vsel %vm1762_vm5, %v4001_v55, %v2775_v11  ;;  %v4193_v14 = vsel %vm1762_vm5, %v4004_v19, %v2776_v53  ;;  %v3007_v55 = vpack.i.bf16 %v558_v52, %v557_v44  ;;  %v581_v19 = vld [vmem:[#allocation2 + $0x7a] sm:$0xff]  ;;  %v3017_v53 = vpack.i.bf16 %v590_v12, %v589_v59 }
 0x197   : > { %2988 = vrot.lane.b32.xlu1 %v2987_v29, %s3095_s12  ;;  %v4196_v58 = vpop.permute.xlu2 %2828  ;;  %2329 = vmatpush.bf16.msra.mxu2 %v2322_v60  ;;  %v3012_v50 = vpack.i.bf16 %v582_v28, %v581_v19 }
 0x198   : > { %2330 = vmatpush.bf16.msra.mxu3 %v2322_v60  ;;  %1988 = vmatpush.bf16.msra.mxu0 %v2322_v60  ;;  %v2831_v59 = vunpack.i.h.bf16 %v4196_v58 }
 0x199   : > { %v2779_v7 = vpop.permute.xlu1 %2778  ;;  %2998 = vrot.lane.b32.xlu0 %v2997_v33, %s3096_s13  ;;  %2328 = vmatpush.bf16.msra.mxu1 %v2322_v60 }
 0x19a   : > { %v2781_v47 = vunpack.i.h.bf16 %v2779_v7  ;;  %v2780_v27 = vunpack.i.l.bf16 %v2779_v7 }
 0x19b   : > { %v2789_v45 = vpop.permute.xlu0 %2788 }
 0x19c   : > { %v4201_v23 = vsel %vm1762_vm5, %v4077_v57, %v2780_v27  ;;  %v4205_v3 = vsel %vm1762_vm5, %v4081_v61, %v2781_v47  ;;  %v2791_v1 = vunpack.i.h.bf16 %v2789_v45  ;;  %v2790_v9 = vunpack.i.l.bf16 %v2789_v45 }
 0x19d   : > { %3008 = vrot.lane.b32.xlu2 %v3007_v55, %s3095_s12  ;;  %v1779_v55 = vsel %vm1762_vm5, %v3959_v10, %v2745_v13  ;;  %v2765_v10 = vunpack.i.l.bf16 %v4174_v41 }
 0x19e   : > { %v4210_v15 = vsel %vm1795_vm6, %v4023_v40, %v2790_v9  ;;  %v4214_v51 = vsel %vm1795_vm6, %v4026_v6, %v2791_v1 }
 0x19f   : > { %3003 = vrot.lane.b32.xlu1 %v3002_v34, %s3095_s12  ;;  %v2844_v57 = vpop.permute.xlu2 %2843 }
 0x1a0   : > { %v2846_v45 = vunpack.i.h.bf16 %v2844_v57 }
 0x1a1   : > { %v2794_v61 = vpop.permute.xlu1 %2793  ;;  %3013 = vrot.lane.b32.xlu0 %v3012_v50, %s3096_s13  ;;  %v2766_v50 = vunpack.i.h.bf16 %v4174_v41 }
 0x1a2   : > { %v2796_v56 = vunpack.i.h.bf16 %v2794_v61  ;;  %v2795_v21 = vunpack.i.l.bf16 %v2794_v61 }
 0x1a3   : > { %v4218_v29 = vpop.permute.xlu0 %2803  ;;  %v1788_v41 = vsel %vm1762_vm5, %v4060_v32, %v2766_v50 }
 0x1a4   : > { %v4222_v40 = vsel %vm1795_vm6, %v4102_v26, %v2795_v21  ;;  %v4226_v6 = vsel %vm1795_vm6, %v4106_v63, %v2796_v56  ;;  %v2746_v63 = vunpack.i.h.bf16 %v4135_v46 }
 0x1a6   : > { %v1780_v28 = vsel %vm1762_vm5, %v3962_v17, %v2746_v63 }
 0x1a7   : > { %3018 = vrot.lane.b32.xlu1 %v3017_v53, %s3096_s13  ;;  %v4229_v11 = vpop.permute.xlu2 %2858  ;;  %s2219_s13 = scalar_lea.hbm %s4590_s4, %s2324_s10 }
 0x1a8   : > { %s2222_s14 = sshll.u32 %s2219_s13, 4  ;;  %s2223_s14 = int_to_ptr.hbm [resolvable:$true] %s2222_s14 }
 0x1a9   : > { %v4231_v33 = vpop.permute.xlu1 %2808  ;;  %s3038_s22 = sshra.s32 %s2223_s14, 4  ;;  %s3039_s22 = int_to_ptr.hbm [resolvable:$true] %s3038_s22 }
 0x1aa   : > { %s3040_s23 = scalar_lea.hbm %s3039_s22, 256  ;;  %p3045_p0 = scmp.lt.s32.totalorder %s3039_s22, %s4590_s4 }
 0x1ab   : > { %v2819_v60 = vpop.permute.xlu0 %2818  ;;  %p3041_p11 = scmp.ne.s32.totalorder %s3039_s22, %s3040_s23  ;;  %p3046_p1 = scmp.lt.s32.totalorder %s3044_s29, %s3040_s23 }
 0x1ac   : > { %v2821_v44 = vunpack.i.h.bf16 %v2819_v60  ;;  %v2820_v52 = vunpack.i.l.bf16 %v2819_v60  ;;  %v1787_v60 = vsel %vm1762_vm5, %v4056_v42, %v2765_v10 }
 0x1ad   : > { %p3042_p12 = pnand %p3041_p11, %p3163_p5  ;;  %p3047_p2 = por %p3046_p1, %p3045_p0 }
 0x1ae   : > { %v4236_v35 = vsel %vm1795_vm6, %v4065_v22, %v2820_v52  ;;  %v4240_v26 = vsel %vm1795_vm6, %v4068_v38, %v2821_v44  ;;  %v2845_v22 = vunpack.i.l.bf16 %v2844_v57  ;;  %v2830_v57 = vunpack.i.l.bf16 %v4196_v58 }
 0x1af   : > { %v4245_v19 = vpop.permute.xlu2 %2873  ;;  %v1821_v58 = vsel %vm1795_vm6, %v1788_v41, %v2831_v59  ;;  %p3043_p13 = pneg %p3042_p12 }
 0x1b0   : > { %v1820_v13 = vsel %vm1795_vm6, %v1787_v60, %v2830_v57 }
 0x1b1   : > { %v2824_v7 = vpop.permute.xlu1 %2823  ;;  %p3048_p3 = pnand %p3047_p2, %p3043_p13 }
 0x1b2   : > { %v2826_v47 = vunpack.i.h.bf16 %v2824_v7  ;;  %v2825_v27 = vunpack.i.l.bf16 %v2824_v7 }
 0x1b3   : > { %v2834_v34 = vpop.permute.xlu0 %2833 }
 0x1b4   : > { %v1812_v38 = vsel %vm1795_vm6, %v1779_v55, %v2825_v27  ;;  %v1813_v1 = vsel %vm1795_vm6, %v1780_v28, %v2826_v47  ;;  %v2836_v46 = vunpack.i.h.bf16 %v2834_v34  ;;  %v2835_v9 = vunpack.i.l.bf16 %v2834_v34 }
 0x1b6   : > { %v1845_v12 = vsel %vm1828_vm10, %v1812_v38, %v2835_v9  ;;  %v1846_v17 = vsel %vm1828_vm10, %v1813_v1, %v2836_v46 }
 0x1b7   : > { %v1878_v61 = vsel %vm1861_vm9, %v1845_v12, %v2845_v22  ;;  %v1879_v56 = vsel %vm1861_vm9, %v1846_v17, %v2846_v45  ;;  %v4268_v47 = vpop.permute.xlu2 %2888  ;;  %v2786_v45 = vunpack.i.h.bf16 %v4132_v2  ;;  %v2785_v22 = vunpack.i.l.bf16 %v4132_v2 }
 0x1b8   : > { %v1902_v21 = vpack.c.bf16 %v1879_v56, %v1878_v61  ;;  %v2806_v2 = vunpack.i.h.bf16 %v4218_v29  ;;  %v2805_v61 = vunpack.i.l.bf16 %v4218_v29 }
 0x1b9   : > { %v2839_v53 = vpop.permute.xlu1 %2838  ;;  %v1796_v9 = vsel %vm1795_vm6, %v4093_v20, %v2785_v22  ;;  %v1797_v50 = vsel %vm1795_vm6, %v4097_v39, %v2786_v45  ;;  %v2860_v39 = vunpack.i.l.bf16 %v4229_v11 }
 0x1ba   : > { %v2841_v44 = vunpack.i.h.bf16 %v2839_v53  ;;  %v2840_v52 = vunpack.i.l.bf16 %v2839_v53  ;;  %2308 = vmatmul.msk.bf16.vlgmr.msra.gmra.mxu2 %vm1925_vm11, %v1902_v21  ;;  %v2861_v53 = vunpack.i.h.bf16 %v4229_v11  ;;  %v1805_v29 = vsel %vm1795_vm6, %v4047_v54, %v2806_v2 }
 0x1bb   : > { %v2849_v63 = vpop.permute.xlu0 %2848 }
 0x1bc   : > { %v1853_v7 = vsel %vm1828_vm10, %v1820_v13, %v2840_v52  ;;  %v1854_v55 = vsel %vm1828_vm10, %v1821_v58, %v2841_v44  ;;  %v2851_v27 = vunpack.i.h.bf16 %v2849_v63  ;;  %v2850_v42 = vunpack.i.l.bf16 %v2849_v63 }
 0x1bd   : > { %v1804_v44 = vsel %vm1795_vm6, %v4044_v62, %v2805_v61  ;;  %v1838_v63 = vsel %vm1828_vm10, %v1805_v29, %v2861_v53  ;;  %v2811_v61 = vunpack.i.h.bf16 %v4231_v33 }
 0x1be   : > { %v1886_v28 = vsel %vm1861_vm9, %v1853_v7, %v2850_v42  ;;  %v1887_v32 = vsel %vm1861_vm9, %v1854_v55, %v2851_v27  ;;  %v1837_v58 = vsel %vm1828_vm10, %v1804_v44, %v2860_v39  ;;  %v2876_v42 = vunpack.i.h.bf16 %v4245_v19 }
 0x1bf   : > { %v1906_v34 = vpack.c.bf16 %v1887_v32, %v1886_v28  ;;  %v4283_v56 = vpop.permute.xlu2 %2903  ;;  %v2875_v28 = vunpack.i.l.bf16 %v4245_v19 }
 0x1c1   : > { %v2854_v38 = vpop.permute.xlu1 %2853  ;;  %2312 = vmatmul.msk.bf16.vlgmr.msra.gmra.mxu3 %vm1925_vm11, %v1906_v34  ;;  %v1814_v22 = vsel %vm1795_vm6, %v4152_v31, %v2875_v28  ;;  %v1815_v34 = vsel %vm1795_vm6, %v4156_v30, %v2876_v42  ;;  %v2890_v31 = vunpack.i.l.bf16 %v4268_v47  ;;  %v2905_v42 = vunpack.i.l.bf16 %v4283_v56 }
 0x1c2   : > { %v2856_v1 = vunpack.i.h.bf16 %v2854_v38  ;;  %v2855_v46 = vunpack.i.l.bf16 %v2854_v38 }
 0x1c3   : > { %v2864_v10 = vpop.permute.xlu0 %2863 }
 0x1c4   : > { %v1829_v59 = vsel %vm1828_vm10, %v1796_v9, %v2855_v46  ;;  %v1830_v12 = vsel %vm1828_vm10, %v1797_v50, %v2856_v1  ;;  %v2866_v17 = vunpack.i.h.bf16 %v2864_v10  ;;  %v2865_v57 = vunpack.i.l.bf16 %v2864_v10 }
 0x1c6   : > { %v1862_v21 = vsel %vm1861_vm9, %v1829_v59, %v2865_v57  ;;  %v1863_v20 = vsel %vm1861_vm9, %v1830_v12, %v2866_v17  ;;  %v2891_v17 = vunpack.i.h.bf16 %v4268_v47 }
 0x1c7   : > { %v1894_v60 = vpack.c.bf16 %v1863_v20, %v1862_v21  ;;  %v2919_v62 = vpop.permute.xlu2 %2918  ;;  %v2810_v21 = vunpack.i.l.bf16 %v4231_v33 }
 0x1c8   : > { %v2920_v47 = vunpack.i.l.bf16 %v2919_v62 }
 0x1c9   : > { %v2869_v41 = vpop.permute.xlu1 %2868  ;;  %2300 = vmatmul.msk.bf16.vlgmr.msra.gmra.mxu0 %vm1925_vm11, %v1894_v60 }
 0x1ca   : > { %v2871_v52 = vunpack.i.h.bf16 %v2869_v41  ;;  %v2870_v13 = vunpack.i.l.bf16 %v2869_v41  ;;  %v2921_v41 = vunpack.i.h.bf16 %v2919_v62 }
 0x1cb   : > { %v2879_v7 = vpop.permute.xlu0 %2878 }
 0x1cc   : > { %v1870_v55 = vsel %vm1861_vm9, %v1837_v58, %v2870_v13  ;;  %v1871_v11 = vsel %vm1861_vm9, %v1838_v63, %v2871_v52  ;;  %v2881_v38 = vunpack.i.h.bf16 %v2879_v7  ;;  %v2880_v1 = vunpack.i.l.bf16 %v2879_v7 }
 0x1cd   : > { %v1898_v27 = vpack.c.bf16 %v1871_v11, %v1870_v55  ;;  %v1806_v58 = vsel %vm1795_vm6, %v4125_v37, %v2810_v21  ;;  %v1807_v63 = vsel %vm1795_vm6, %v4129_v24, %v2811_v61  ;;  %v1831_v24 = vsel %vm1828_vm10, %v4210_v15, %v2905_v42 }
 0x1ce   : > { %v1822_v30 = vsel %vm1795_vm6, %v4112_v0, %v2880_v1  ;;  %v1823_v2 = vsel %vm1795_vm6, %v4115_v4, %v2881_v38 }
 0x1cf   : > { %2304 = vmatmul.msk.bf16.vlgmr.msra.gmra.mxu1 %vm1925_vm11, %v1898_v27  ;;  %v4318_v53 = vpop.permute.xlu2 %2933  ;;  %v1855_v29 = vsel %vm1828_vm10, %v1822_v30, %v2890_v31  ;;  %v1856_v0 = vsel %vm1828_vm10, %v1823_v2, %v2891_v17  ;;  %v2906_v27 = vunpack.i.h.bf16 %v4283_v56 }
 0x1d1   : > { %v2884_v54 = vpop.permute.xlu1 %2883 }
 0x1d2   : > { %v2886_v32 = vunpack.i.h.bf16 %v2884_v54  ;;  %v2885_v45 = vunpack.i.l.bf16 %v2884_v54 }
 0x1d3   : > { %v2894_v46 = vpop.permute.xlu0 %2893 }
 0x1d4   : > { %v1847_v9 = vsel %vm1828_vm10, %v1814_v22, %v2885_v45  ;;  %v1848_v50 = vsel %vm1828_vm10, %v1815_v34, %v2886_v32  ;;  %v2896_v19 = vunpack.i.h.bf16 %v2894_v46  ;;  %v2895_v10 = vunpack.i.l.bf16 %v2894_v46 }
 0x1d5   : > { %v1832_v22 = vsel %vm1828_vm10, %v4214_v51, %v2906_v27 }
 0x1d6   : > { %v1880_v59 = vsel %vm1861_vm9, %v1847_v9, %v2895_v10  ;;  %v1881_v12 = vsel %vm1861_vm9, %v1848_v50, %v2896_v19 }
 0x1d7   : > { %v1903_v57 = vpack.c.bf16 %v1881_v12, %v1880_v59  ;;  %v2949_v56 = vpop.permute.xlu2 %2948 }
 0x1d8   : > { %v2951_v10 = vunpack.i.h.bf16 %v2949_v56  ;;  %v2950_v59 = vunpack.i.l.bf16 %v2949_v56 }
 0x1d9   : > { %v2899_v20 = vpop.permute.xlu1 %2898  ;;  %2309 = vmatmul.msk.bf16.gmra.mxu2 %vm1925_vm11, %v1903_v57 }
 0x1da   : > { %v2901_v39 = vunpack.i.h.bf16 %v2899_v20  ;;  %v2900_v60 = vunpack.i.l.bf16 %v2899_v20  ;;  %v2936_v20 = vunpack.i.h.bf16 %v4318_v53 }
 0x1db   : > { %v2909_v44 = vpop.permute.xlu0 %2908 }
 0x1dc   : > { %v2911_v52 = vunpack.i.h.bf16 %v2909_v44  ;;  %v2910_v4 = vunpack.i.l.bf16 %v2909_v44  ;;  %v1888_v13 = vsel %vm1861_vm9, %v1855_v29, %v2900_v60  ;;  %v1889_v33 = vsel %vm1861_vm9, %v1856_v0, %v2901_v39 }
 0x1dd   : > { %v1907_v7 = vpack.c.bf16 %v1889_v33, %v1888_v13  ;;  %v2935_v39 = vunpack.i.l.bf16 %v4318_v53 }
 0x1de   : > { %v1839_v55 = vsel %vm1828_vm10, %v1806_v58, %v2910_v4  ;;  %v1840_v11 = vsel %vm1828_vm10, %v1807_v63, %v2911_v52 }
 0x1df   : > { %2313 = vmatmul.msk.bf16.gmra.mxu3 %vm1925_vm11, %v1907_v7  ;;  %v1872_v28 = vsel %vm1861_vm9, %v1839_v55, %v2920_v47  ;;  %v1873_v62 = vsel %vm1861_vm9, %v1840_v11, %v2921_v41  ;;  %v2964_v2 = vpop.permute.xlu2 %2963 }
 0x1e0   : > { %v1899_v54 = vpack.c.bf16 %v1873_v62, %v1872_v28  ;;  %v2966_v52 = vunpack.i.h.bf16 %v2964_v2  ;;  %v2965_v4 = vunpack.i.l.bf16 %v2964_v2 }
 0x1e1   : > { %v2914_v37 = vpop.permute.xlu1 %2913 }
 0x1e2   : > { %v2916_v32 = vunpack.i.h.bf16 %v2914_v37  ;;  %v2915_v45 = vunpack.i.l.bf16 %v2914_v37  ;;  %2305 = vmatmul.msk.bf16.gmra.mxu1 %vm1925_vm11, %v1899_v54 }
 0x1e3   : > { %v2924_v34 = vpop.permute.xlu0 %2923 }
 0x1e4   : > { %v1864_v38 = vsel %vm1861_vm9, %v1831_v24, %v2915_v45  ;;  %v1865_v1 = vsel %vm1861_vm9, %v1832_v22, %v2916_v32  ;;  %v2926_v12 = vunpack.i.h.bf16 %v2924_v34  ;;  %v2925_v17 = vunpack.i.l.bf16 %v2924_v34 }
 0x1e5   : > { %v1895_v46 = vpack.c.bf16 %v1865_v1, %v1864_v38 }
 0x1e7   : > { %2301 = vmatmul.msk.bf16.gmra.mxu0 %vm1925_vm11, %v1895_v46  ;;  %v2979_v28 = vpop.permute.xlu2 %2978 }
 0x1e9   : > { %v2929_v9 = vpop.permute.xlu1 %2928 }
 0x1ea   : > { %v2931_v50 = vunpack.i.h.bf16 %v2929_v9  ;;  %v2930_v19 = vunpack.i.l.bf16 %v2929_v9 }
 0x1eb   : > { %v2939_v15 = vpop.permute.xlu0 %2938 }
 0x1ec   : > { %v1824_v51 = vsel %vm1795_vm6, %v4189_v43, %v2930_v19  ;;  %v1825_v31 = vsel %vm1795_vm6, %v4193_v14, %v2931_v50  ;;  %v2941_v57 = vunpack.i.h.bf16 %v2939_v15  ;;  %v2940_v30 = vunpack.i.l.bf16 %v2939_v15 }
 0x1ed   : > { %v1816_v43 = vsel %vm1795_vm6, %v4086_v25, %v2925_v17  ;;  %v1817_v14 = vsel %vm1795_vm6, %v4089_v18, %v2926_v12 }
 0x1ee   : > { %v1857_v61 = vsel %vm1828_vm10, %v1824_v51, %v2940_v30  ;;  %v1858_v21 = vsel %vm1828_vm10, %v1825_v31, %v2941_v57  ;;  %v1849_v53 = vsel %vm1828_vm10, %v1816_v43, %v2935_v39  ;;  %v1850_v33 = vsel %vm1828_vm10, %v1817_v14, %v2936_v20 }
 0x1ef   : > { %v1890_v60 = vsel %vm1861_vm9, %v1857_v61, %v2950_v59  ;;  %v1891_v41 = vsel %vm1861_vm9, %v1858_v21, %v2951_v10  ;;  %v2994_v46 = vpop.permute.xlu2 %2993  ;;  %v2981_v31 = vunpack.i.h.bf16 %v2979_v28  ;;  %v2980_v57 = vunpack.i.l.bf16 %v2979_v28 }
 0x1f0   : > { %v1908_v47 = vpack.c.bf16 %v1891_v41, %v1890_v60  ;;  %v2996_v19 = vunpack.i.h.bf16 %v2994_v46  ;;  %v2995_v10 = vunpack.i.l.bf16 %v2994_v46 }
 0x1f1   : > { %v2944_v44 = vpop.permute.xlu1 %2943 }
 0x1f2   : > { %v2946_v29 = vunpack.i.h.bf16 %v2944_v44  ;;  %v2945_v0 = vunpack.i.l.bf16 %v2944_v44  ;;  %2314 = vmatmul.msk.bf16.gmra.mxu3 %vm1925_vm11, %v1908_v47 }
 0x1f3   : > { %v2954_v13 = vpop.permute.xlu0 %2953 }
 0x1f4   : > { %v2956_v58 = vunpack.i.h.bf16 %v2954_v13  ;;  %v2955_v63 = vunpack.i.l.bf16 %v2954_v13  ;;  %v1882_v25 = vsel %vm1861_vm9, %v1849_v53, %v2945_v0  ;;  %v1883_v7 = vsel %vm1861_vm9, %v1850_v33, %v2946_v29 }
 0x1f5   : > { %v1904_v18 = vpack.c.bf16 %v1883_v7, %v1882_v25 }
 0x1f6   : > { %v1833_v55 = vsel %vm1828_vm10, %v4222_v40, %v2955_v63  ;;  %v1834_v11 = vsel %vm1828_vm10, %v4226_v6, %v2956_v58 }
 0x1f7   : > { %2310 = vmatmul.msk.bf16.gmra.mxu2 %vm1925_vm11, %v1904_v18  ;;  %v1866_v27 = vsel %vm1861_vm9, %v1833_v55, %v2965_v4  ;;  %v1867_v42 = vsel %vm1861_vm9, %v1834_v11, %v2966_v52  ;;  %v3009_v53 = vpop.permute.xlu2 %3008 }
 0x1f8   : > { %v1896_v62 = vpack.c.bf16 %v1867_v42, %v1866_v27  ;;  %v3011_v18 = vunpack.i.h.bf16 %v3009_v53  ;;  %v3010_v55 = vunpack.i.l.bf16 %v3009_v53 }
 0x1f9   : > { %v2959_v54 = vpop.permute.xlu1 %2958 }
 0x1fa   : > { %v2961_v37 = vunpack.i.h.bf16 %v2959_v54  ;;  %v2960_v32 = vunpack.i.l.bf16 %v2959_v54  ;;  %2302 = vmatmul.msk.bf16.gmra.mxu0 %vm1925_vm11, %v1896_v62 }
 0x1fb   : > { %v2969_v45 = vpop.permute.xlu0 %2968 }
 0x1fc   : > { %v1841_v40 = vsel %vm1828_vm10, %v4178_v16, %v2960_v32  ;;  %v1842_v6 = vsel %vm1828_vm10, %v4181_v49, %v2961_v37  ;;  %v2971_v24 = vunpack.i.h.bf16 %v2969_v45  ;;  %v2970_v22 = vunpack.i.l.bf16 %v2969_v45  ;;  %v4412_v32 = vld [vmem:[%s4588_s2] ss:$0 sm:$0xff] }
 0x1fe   : > { %v1874_v34 = vsel %vm1861_vm9, %v1841_v40, %v2970_v22  ;;  %v1875_v56 = vsel %vm1861_vm9, %v1842_v6, %v2971_v24 }
 0x1ff   : > { %v1900_v38 = vpack.c.bf16 %v1875_v56, %v1874_v34 }
 0x201   : > { %v2974_v1 = vpop.permute.xlu1 %2973  ;;  %2306 = vmatmul.msk.bf16.gmra.mxu1 %vm1925_vm11, %v1900_v38 }
 0x202   : > { %v2976_v9 = vunpack.i.h.bf16 %v2974_v1  ;;  %v2975_v50 = vunpack.i.l.bf16 %v2974_v1 }
 0x203   : > { %v2984_v59 = vpop.permute.xlu0 %2983 }
 0x204   : > { %v1818_v16 = vsel %vm1795_vm6, %v4161_v48, %v2975_v50  ;;  %v1819_v49 = vsel %vm1795_vm6, %v4165_v8, %v2976_v9  ;;  %v2986_v12 = vunpack.i.h.bf16 %v2984_v59  ;;  %v2985_v17 = vunpack.i.l.bf16 %v2984_v59 }
 0x205   : > { %v1826_v48 = vsel %vm1795_vm6, %v4201_v23, %v2980_v57  ;;  %v1827_v8 = vsel %vm1795_vm6, %v4205_v3, %v2981_v31 }
 0x206   : > { %v1851_v15 = vsel %vm1828_vm10, %v1818_v16, %v2985_v17  ;;  %v1852_v51 = vsel %vm1828_vm10, %v1819_v49, %v2986_v12 }
 0x207   : > { %v1884_v30 = vsel %vm1861_vm9, %v1851_v15, %v2995_v10  ;;  %v1885_v2 = vsel %vm1861_vm9, %v1852_v51, %v2996_v19 }
 0x208   : > { %v1905_v61 = vpack.c.bf16 %v1885_v2, %v1884_v30 }
 0x209   : > { %v2989_v21 = vpop.permute.xlu1 %2988 }
 0x20a   : > { %v2991_v20 = vunpack.i.h.bf16 %v2989_v21  ;;  %v2990_v39 = vunpack.i.l.bf16 %v2989_v21  ;;  %2311 = vmatmul.msk.bf16.gmra.mxu2 %vm1925_vm11, %v1905_v61 }
 0x20b   : > { %v2999_v60 = vpop.permute.xlu0 %2998 }
 0x20c   : > { %v1859_v41 = vsel %vm1828_vm10, %v1826_v48, %v2990_v39  ;;  %v1860_v43 = vsel %vm1828_vm10, %v1827_v8, %v2991_v20  ;;  %v3001_v14 = vunpack.i.h.bf16 %v2999_v60  ;;  %v3000_v47 = vunpack.i.l.bf16 %v2999_v60 }
 0x20e   : > { %v1892_v44 = vsel %vm1861_vm9, %v1859_v41, %v3000_v47  ;;  %v1893_v29 = vsel %vm1861_vm9, %v1860_v43, %v3001_v14 }
 0x20f   : > { %v1909_v0 = vpack.c.bf16 %v1893_v29, %v1892_v44 }
 0x211   : > { %v3004_v52 = vpop.permute.xlu1 %3003  ;;  %2315 = vmatmul.msk.bf16.gmra.mxu3 %vm1925_vm11, %v1909_v0 }
 0x212   : > { %v3006_v4 = vunpack.i.h.bf16 %v3004_v52  ;;  %v3005_v23 = vunpack.i.l.bf16 %v3004_v52 }
 0x213   : > { %v3014_v13 = vpop.permute.xlu0 %3013 }
 0x214   : > { %v1835_v3 = vsel %vm1828_vm10, %v4145_v36, %v3005_v23  ;;  %v1836_v33 = vsel %vm1828_vm10, %v4148_v5, %v3006_v4  ;;  %v3016_v58 = vunpack.i.h.bf16 %v3014_v13  ;;  %v3015_v63 = vunpack.i.l.bf16 %v3014_v13 }
 0x215   : > { %v1843_v36 = vsel %vm1828_vm10, %v4236_v35, %v3010_v55  ;;  %v1844_v5 = vsel %vm1828_vm10, %v4240_v26, %v3011_v18  ;;  %v4418_v35 = vld [vmem:[%s4589_s3] ss:$0 sm:$0xff] }
 0x216   : > { %v1868_v25 = vsel %vm1861_vm9, %v1835_v3, %v3015_v63  ;;  %v1869_v7 = vsel %vm1861_vm9, %v1836_v33, %v3016_v58 }
 0x217   : > { %v1897_v11 = vpack.c.bf16 %v1869_v7, %v1868_v25 }
 0x219   : > { %v3019_v27 = vpop.permute.xlu1 %3018  ;;  %2303 = vmatmul.msk.bf16.gmra.mxu0 %vm1925_vm11, %v1897_v11 }
 0x21a   : > { %v3021_v42 = vunpack.i.h.bf16 %v3019_v27  ;;  %v3020_v28 = vunpack.i.l.bf16 %v3019_v27 }
 0x21c   : > { %v1876_v62 = vsel %vm1861_vm9, %v1843_v36, %v3020_v28  ;;  %v1877_v54 = vsel %vm1861_vm9, %v1844_v5, %v3021_v42 }
 0x21d   : > { %v1901_v37 = vpack.c.bf16 %v1877_v54, %v1876_v62 }
 0x21f   : > { %2307 = vmatmul.msk.bf16.gmra.mxu1 %vm1925_vm11, %v1901_v37 }
 0x23d   : > { %v2030_v45 = vpop.f32.mrf.mxu2 }
 0x23e   : > { %v2090_v26 = vmul.f32 %v4412_v32, %v2030_v45 }
 0x240   : > { %v2126_v40 = vadd.f32 %v4418_v35, %v2090_v26 }
 0x242   : > { %v2158_v6 = vmax.f32 %v2126_v40, 0.0 }
 0x244   : > { %2191 = vst.msk [vmem:[%s4424_s9 + $0x80] sm:$0xff] %vm2174_vm12, %v2158_v6  ;;  %v2050_v24 = vpop.f32.mrf.mxu3 }
 0x245   : > { %v2098_v22 = vmul.f32 %v4412_v32, %v2050_v24  ;;  %v2032_v34 = vpop.f32.mrf.mxu2 }
 0x246   : > { %v2091_v56 = vmul.f32 %v4412_v32, %v2032_v34  ;;  %v1990_v38 = vpop.f32.mrf.mxu0 }
 0x247   : > { %v2134_v1 = vadd.f32 %v4418_v35, %v2098_v22  ;;  %v2074_v46 = vmul.f32 %v4412_v32, %v1990_v38 }
 0x248   : > { %v2127_v9 = vadd.f32 %v4418_v35, %v2091_v56 }
 0x249   : > { %v2166_v50 = vmax.f32 %v2134_v1, 0.0  ;;  %v2110_v19 = vadd.f32 %v4418_v35, %v2074_v46 }
 0x24a   : > { %v2159_v10 = vmax.f32 %v2127_v9, 0.0 }
 0x24b   : > { %2199 = vst.msk [vmem:[%s4424_s9 + $0xc0] sm:$0xff] %vm2174_vm12, %v2166_v50  ;;  %v2142_v59 = vmax.f32 %v2110_v19, 0.0 }
 0x24c   : > { %2192 = vst.msk [vmem:[%s4424_s9 + $0x88] sm:$0xff] %vm2174_vm12, %v2159_v10  ;;  %v2010_v16 = vpop.f32.mrf.mxu1  ;;  %v2052_v49 = vpop.f32.mrf.mxu3 }
 0x24d   : > { %2175 = vst.msk [vmem:[%s4424_s9] sm:$0xff] %vm2174_vm12, %v2142_v59  ;;  %v2082_v12 = vmul.f32 %v4412_v32, %v2010_v16  ;;  %v2099_v17 = vmul.f32 %v4412_v32, %v2052_v49 }
 0x24e   : > { %v1992_v15 = vpop.f32.mrf.mxu0 }
 0x24f   : > { %v2118_v51 = vadd.f32 %v4418_v35, %v2082_v12  ;;  %v2135_v31 = vadd.f32 %v4418_v35, %v2099_v17  ;;  %v2075_v57 = vmul.f32 %v4412_v32, %v1992_v15 }
 0x251   : > { %v2150_v30 = vmax.f32 %v2118_v51, 0.0  ;;  %v2167_v2 = vmax.f32 %v2135_v31, 0.0  ;;  %v2111_v61 = vadd.f32 %v4418_v35, %v2075_v57 }
 0x253   : > { %2183 = vst.msk [vmem:[%s4424_s9 + $0x40] sm:$0xff] %vm2174_vm12, %v2150_v30  ;;  %v2143_v21 = vmax.f32 %v2111_v61, 0.0 }
 0x254   : > { %2200 = vst.msk [vmem:[%s4424_s9 + $0xc8] sm:$0xff] %vm2174_vm12, %v2167_v2  ;;  %v2012_v20 = vpop.f32.mrf.mxu1 }
 0x255   : > { %2176 = vst.msk [vmem:[%s4424_s9 + $0x8] sm:$0xff] %vm2174_vm12, %v2143_v21  ;;  %v2083_v39 = vmul.f32 %v4412_v32, %v2012_v20 }
 0x257   : > { %v2119_v48 = vadd.f32 %v4418_v35, %v2083_v39 }
 0x259   : > { %v2151_v8 = vmax.f32 %v2119_v48, 0.0 }
 0x25b   : > { %2184 = vst.msk [vmem:[%s4424_s9 + $0x48] sm:$0xff] %vm2174_vm12, %v2151_v8 }
 0x25c   : > { %v2035_v60 = vpop.f32.mrf.mxu2 }
 0x25d   : > { %v2092_v41 = vmul.f32 %v4412_v32, %v2035_v60 }
 0x25f   : > { %v2128_v43 = vadd.f32 %v4418_v35, %v2092_v41  ;;  %v2015_v14 = vpop.f32.mrf.mxu1 }
 0x260   : > { %v2084_v47 = vmul.f32 %v4412_v32, %v2015_v14 }
 0x261   : > { %v2160_v44 = vmax.f32 %v2128_v43, 0.0 }
 0x262   : > { %v2120_v29 = vadd.f32 %v4418_v35, %v2084_v47  ;;  %v2055_v0 = vpop.f32.mrf.mxu3 }
 0x263   : > { %2193 = vst.msk [vmem:[%s4424_s9 + $0x90] sm:$0xff] %vm2174_vm12, %v2160_v44  ;;  %v2100_v52 = vmul.f32 %v4412_v32, %v2055_v0 }
 0x264   : > { %v2152_v4 = vmax.f32 %v2120_v29, 0.0  ;;  %v1995_v23 = vpop.f32.mrf.mxu0  ;;  %v2037_v13 = vpop.f32.mrf.mxu2 }
 0x265   : > { %v2136_v53 = vadd.f32 %v4418_v35, %v2100_v52  ;;  %v2076_v3 = vmul.f32 %v4412_v32, %v1995_v23  ;;  %v2093_v33 = vmul.f32 %v4412_v32, %v2037_v13 }
 0x266   : > { %2185 = vst.msk [vmem:[%s4424_s9 + $0x50] sm:$0xff] %vm2174_vm12, %v2152_v4 }
 0x267   : > { %v2168_v58 = vmax.f32 %v2136_v53, 0.0  ;;  %v2112_v63 = vadd.f32 %v4418_v35, %v2076_v3  ;;  %v2129_v25 = vadd.f32 %v4418_v35, %v2093_v33  ;;  %v2017_v7 = vpop.f32.mrf.mxu1 }
 0x268   : > { %v2085_v18 = vmul.f32 %v4412_v32, %v2017_v7 }
 0x269   : > { %2201 = vst.msk [vmem:[%s4424_s9 + $0xd0] sm:$0xff] %vm2174_vm12, %v2168_v58  ;;  %v2144_v55 = vmax.f32 %v2112_v63, 0.0  ;;  %v2161_v11 = vmax.f32 %v2129_v25, 0.0 }
 0x26a   : > { %v2121_v27 = vadd.f32 %v4418_v35, %v2085_v18  ;;  %v2057_v42 = vpop.f32.mrf.mxu3 }
 0x26b   : > { %2177 = vst.msk [vmem:[%s4424_s9 + $0x10] sm:$0xff] %vm2174_vm12, %v2144_v55  ;;  %v2101_v28 = vmul.f32 %v4412_v32, %v2057_v42 }
 0x26c   : > { %2194 = vst.msk [vmem:[%s4424_s9 + $0x98] sm:$0xff] %vm2174_vm12, %v2161_v11  ;;  %v2153_v36 = vmax.f32 %v2121_v27, 0.0  ;;  %v1997_v5 = vpop.f32.mrf.mxu0 }
 0x26d   : > { %v2137_v62 = vadd.f32 %v4418_v35, %v2101_v28  ;;  %v2077_v54 = vmul.f32 %v4412_v32, %v1997_v5 }
 0x26e   : > { %2186 = vst.msk [vmem:[%s4424_s9 + $0x58] sm:$0xff] %vm2174_vm12, %v2153_v36 }
 0x26f   : > { %v2169_v37 = vmax.f32 %v2137_v62, 0.0  ;;  %v2113_v45 = vadd.f32 %v4418_v35, %v2077_v54 }
 0x271   : > { %2202 = vst.msk [vmem:[%s4424_s9 + $0xd8] sm:$0xff] %vm2174_vm12, %v2169_v37  ;;  %v2145_v26 = vmax.f32 %v2113_v45, 0.0 }
 0x273   : > { %2178 = vst.msk [vmem:[%s4424_s9 + $0x18] sm:$0xff] %vm2174_vm12, %v2145_v26 }
 0x275   : > { %v2060_v40 = vpop.f32.mrf.mxu3 }
 0x276   : > { %v2102_v6 = vmul.f32 %v4412_v32, %v2060_v40 }
 0x277   : > { %v2000_v24 = vpop.f32.mrf.mxu0 }
 0x278   : > { %v2138_v22 = vadd.f32 %v4418_v35, %v2102_v6  ;;  %v2078_v34 = vmul.f32 %v4412_v32, %v2000_v24 }
 0x27a   : > { %v2170_v56 = vmax.f32 %v2138_v22, 0.0  ;;  %v2114_v38 = vadd.f32 %v4418_v35, %v2078_v34  ;;  %v2040_v1 = vpop.f32.mrf.mxu2 }
 0x27b   : > { %v2094_v46 = vmul.f32 %v4412_v32, %v2040_v1 }
 0x27c   : > { %2203 = vst.msk [vmem:[%s4424_s9 + $0xe0] sm:$0xff] %vm2174_vm12, %v2170_v56  ;;  %v2146_v9 = vmax.f32 %v2114_v38, 0.0 }
 0x27d   : > { %v2130_v50 = vadd.f32 %v4418_v35, %v2094_v46  ;;  %v2062_v19 = vpop.f32.mrf.mxu3 }
 0x27e   : > { %2179 = vst.msk [vmem:[%s4424_s9 + $0x20] sm:$0xff] %vm2174_vm12, %v2146_v9  ;;  %v2103_v10 = vmul.f32 %v4412_v32, %v2062_v19  ;;  %v2020_v59 = vpop.f32.mrf.mxu1 }
 0x27f   : > { %v2162_v16 = vmax.f32 %v2130_v50, 0.0  ;;  %v2086_v49 = vmul.f32 %v4412_v32, %v2020_v59  ;;  %v2002_v12 = vpop.f32.mrf.mxu0 }
 0x280   : > { %v2139_v17 = vadd.f32 %v4418_v35, %v2103_v10  ;;  %v2079_v15 = vmul.f32 %v4412_v32, %v2002_v12 }
 0x281   : > { %2195 = vst.msk [vmem:[%s4424_s9 + $0xa0] sm:$0xff] %vm2174_vm12, %v2162_v16  ;;  %v2122_v51 = vadd.f32 %v4418_v35, %v2086_v49 }
 0x282   : > { %v2171_v31 = vmax.f32 %v2139_v17, 0.0  ;;  %v2115_v57 = vadd.f32 %v4418_v35, %v2079_v15  ;;  %v2042_v30 = vpop.f32.mrf.mxu2 }
 0x283   : > { %v2154_v2 = vmax.f32 %v2122_v51, 0.0  ;;  %v2095_v61 = vmul.f32 %v4412_v32, %v2042_v30 }
 0x284   : > { %2204 = vst.msk [vmem:[%s4424_s9 + $0xe8] sm:$0xff] %vm2174_vm12, %v2171_v31  ;;  %v2147_v21 = vmax.f32 %v2115_v57, 0.0 }
 0x285   : > { %2187 = vst.msk [vmem:[%s4424_s9 + $0x60] sm:$0xff] %vm2174_vm12, %v2154_v2  ;;  %v2131_v20 = vadd.f32 %v4418_v35, %v2095_v61 }
 0x286   : > { %2180 = vst.msk [vmem:[%s4424_s9 + $0x28] sm:$0xff] %vm2174_vm12, %v2147_v21  ;;  %v2022_v39 = vpop.f32.mrf.mxu1 }
 0x287   : > { %v2163_v48 = vmax.f32 %v2131_v20, 0.0  ;;  %v2087_v8 = vmul.f32 %v4412_v32, %v2022_v39 }
 0x289   : > { %2196 = vst.msk [vmem:[%s4424_s9 + $0xa8] sm:$0xff] %vm2174_vm12, %v2163_v48  ;;  %v2123_v60 = vadd.f32 %v4418_v35, %v2087_v8 }
 0x28b   : > { %v2155_v41 = vmax.f32 %v2123_v60, 0.0 }
 0x28d   : > { %2188 = vst.msk [vmem:[%s4424_s9 + $0x68] sm:$0xff] %vm2174_vm12, %v2155_v41  ;;  %v2045_v43 = vpop.f32.mrf.mxu2 }
 0x28e   : > { %v2096_v14 = vmul.f32 %v4412_v32, %v2045_v43 }
 0x290   : > { %v2132_v47 = vadd.f32 %v4418_v35, %v2096_v14 }
 0x292   : > { %v2164_v44 = vmax.f32 %v2132_v47, 0.0 }
 0x294   : > { %2197 = vst.msk [vmem:[%s4424_s9 + $0xb0] sm:$0xff] %vm2174_vm12, %v2164_v44  ;;  %v2065_v29 = vpop.f32.mrf.mxu3 }
 0x295   : > { %v2104_v0 = vmul.f32 %v4412_v32, %v2065_v29  ;;  %v2047_v52 = vpop.f32.mrf.mxu2 }
 0x296   : > { %v2097_v4 = vmul.f32 %v4412_v32, %v2047_v52  ;;  %v2005_v23 = vpop.f32.mrf.mxu0 }
 0x297   : > { %v2140_v13 = vadd.f32 %v4418_v35, %v2104_v0  ;;  %v2080_v53 = vmul.f32 %v4412_v32, %v2005_v23 }
 0x298   : > { %v2133_v3 = vadd.f32 %v4418_v35, %v2097_v4 }
 0x299   : > { %v2172_v33 = vmax.f32 %v2140_v13, 0.0  ;;  %v2116_v58 = vadd.f32 %v4418_v35, %v2080_v53 }
 0x29a   : > { %v2165_v63 = vmax.f32 %v2133_v3, 0.0 }
 0x29b   : > { %2205 = vst.msk [vmem:[%s4424_s9 + $0xf0] sm:$0xff] %vm2174_vm12, %v2172_v33  ;;  %v2148_v25 = vmax.f32 %v2116_v58, 0.0 }
 0x29c   : > { %2198 = vst.msk [vmem:[%s4424_s9 + $0xb8] sm:$0xff] %vm2174_vm12, %v2165_v63  ;;  %v2025_v7 = vpop.f32.mrf.mxu1  ;;  %v2067_v18 = vpop.f32.mrf.mxu3 }
 0x29d   : > { %2181 = vst.msk [vmem:[%s4424_s9 + $0x30] sm:$0xff] %vm2174_vm12, %v2148_v25  ;;  %v2088_v55 = vmul.f32 %v4412_v32, %v2025_v7  ;;  %v2105_v11 = vmul.f32 %v4412_v32, %v2067_v18 }
 0x29e   : > { %v2007_v27 = vpop.f32.mrf.mxu0 }
 0x29f   : > { %v2124_v42 = vadd.f32 %v4418_v35, %v2088_v55  ;;  %v2141_v28 = vadd.f32 %v4418_v35, %v2105_v11  ;;  %v2081_v36 = vmul.f32 %v4412_v32, %v2007_v27 }
 0x2a1   : > { %v2156_v5 = vmax.f32 %v2124_v42, 0.0  ;;  %v2173_v62 = vmax.f32 %v2141_v28, 0.0  ;;  %v2117_v54 = vadd.f32 %v4418_v35, %v2081_v36 }
 0x2a3   : > { %2189 = vst.msk [vmem:[%s4424_s9 + $0x70] sm:$0xff] %vm2174_vm12, %v2156_v5  ;;  %v2149_v37 = vmax.f32 %v2117_v54, 0.0 }
 0x2a4   : > { %2206 = vst.msk [vmem:[%s4424_s9 + $0xf8] sm:$0xff] %vm2174_vm12, %v2173_v62  ;;  %v2027_v45 = vpop.f32.mrf.mxu1 }
 0x2a5   : > { %2182 = vst.msk [vmem:[%s4424_s9 + $0x38] sm:$0xff] %vm2174_vm12, %v2149_v37  ;;  %v2089_v26 = vmul.f32 %v4412_v32, %v2027_v45 }
 0x2a7   : > { %v2125_v40 = vadd.f32 %v4418_v35, %v2089_v26 }
 0x2a9   : > { %v2157_v6 = vmax.f32 %v2125_v40, 0.0 }
 0x2ab   : > { %2190 = vst.msk [vmem:[%s4424_s9 + $0x78] sm:$0xff] %vm2174_vm12, %v2157_v6 }
 0x2ac   : > { %3051 = shalt.err (!%p3048_p3)
}
 0x2ad   : > { %s3098_s5 = smov 128   ;;  %s3099_s7 = smov 8  }
 0x2ae   : > { %2331 = dma.vmem_to_hbm [thread:$0]  (%p3163_p5), %s2221_s19, 4096, %s2223_s14, %s2208_s20, %s3098_s5, %s3098_s5, %s3099_s7  }
 0x2af PF: > { %p2337_p4 = scmp.ge.s32.totalorder %s3086_s18, 2  ;;  %s2237_s8 = sand.u32 1, %s3074_s15  }
 0x2b0   : > { %s2238_s9 = scalar_lea.sflag [#allocation4], %s2237_s8 }
 0x2b1   : > { %p2334_p7 = pnand %p2337_p4, %p3167_p6 }
 0x2b3   : > { %p2335_p8 = pneg %p2334_p7 }
 0x2b5   : > { %3069 = dma.done.wait (%p2335_p8), %s2238_s9, 4096  }
 0x2b6   : > { %3071 = vsyncadd (%p2335_p8), %s2238_s9, 4294963200  ;;  %p14_p9 = scmp.ge.s32.totalorder %s3150_s21, 4   ;;  %s4656_s15 = smov %s3078_s16 }
 0x2b7   : > { %s4657_s16 = smov %s3082_s17  ;;  %s4658_s17 = smov %s3161_s24 }
 0x2b8   : > { %s4659_s18 = smov %s3150_s21  ;;  %16 = sbr.rel (!%p14_p9) target bundleno = 3 (0x3), region = 73 }
 0x2bd   :  { %2244 = vsyncpa [#allocation4], 1 }
 0x2be   :  { %2246 = vsyncpa [#allocation4 + $0x1], 1 }

</bundles_post_ra>
